<compile_context>
chip_gen: v7x
topology: tpu7x:2x2x1
jax: 0.10.0
libtpu: 0.0.40
codegen_flags: <defaults>
</compile_context>

<pallas_src>
import math

import jax
import jax.numpy as jnp
from jax.experimental import pallas as pl
from jax.experimental.pallas import tpu as pltpu  # noqa: F401

# ---------------------------------------------------------------- config
IMAGE_SIZE = 16
PATCH = 8
PP = PATCH * PATCH                     # 64
HIDDEN = 32
HEADS = 2
HEAD_DIM = HIDDEN // HEADS             # 16
LAYERS = 2
MLP = 64
BATCH = 2
N_PATCH = (IMAGE_SIZE // PATCH) ** 2   # 4
SEQ = N_PATCH + 1                      # 5 (class token + patches)
LN_EPS = 1e-6                          # torchvision ViT uses LayerNorm(eps=1e-6)
LANES = 128

# -------- weight-slab row offsets (per layer, bf16, every matrix starts at lane 0) --------
W_QKV = 0                              # 6 blocks (HIDDEN, HEAD_DIM): q0,k0,v0,q1,k1,v1
W_O = 3 * HEADS * HIDDEN               # 192: HEADS blocks (HEAD_DIM, HIDDEN)
W_1 = W_O + HEADS * HEAD_DIM           # 224: (HIDDEN, MLP)
W_2 = W_1 + HIDDEN                     # 256: (MLP, HIDDEN)
W_ROWS = W_2 + MLP                     # 320 rows per layer (multiples of 16 -> bf16-tile safe)

# -------- constants-slab row offsets (f32) --------
C_CONV = 0                             # (PP, HIDDEN) channel-folded conv weight
C_ADD = C_CONV + PP                    # 64: (N*SEQ, HIDDEN) cls/conv_b + pos, tiled over batch
C_MASK = C_ADD + 16                    # 80: (N*SEQ, N*SEQ) block-diagonal batch mask
C_CLS = C_MASK + 16                    # 96: (N, N*SEQ) class-token selector
C_HEAD = C_CLS + 8                     # 104: row 0 = folded head weight, row 1 lane 0 = bias
C_BIAS = C_HEAD + 8                    # 112: 16 bias rows per layer
C_ROWS = C_BIAS + 16 * LAYERS          # 144


# ---------------------------------------------------------------- in-kernel helpers
def _ln(x):
    # affine-free LayerNorm (affines are folded into the following linear's weights/biases)
    mu = jnp.mean(x, axis=-1, keepdims=True)
    xc = x - mu
    var = jnp.mean(xc * xc, axis=-1, keepdims=True)
    return xc * jax.lax.rsqrt(var + LN_EPS)


def _gelu(x):
    # exact erf GELU (torch.nn.GELU default); kept exact for semantic fidelity
    return 0.5 * x * (1.0 + jax.lax.erf(x * (1.0 / math.sqrt(2.0))))


def _mxdot(a, b):
    # bf16 MXU operands, f32 accumulation
    return jnp.dot(a.astype(jnp.bfloat16), b.astype(jnp.bfloat16),
                   preferred_element_type=jnp.float32)


def _mxdot_nt(a, b):
    # a @ b.T with bf16 MXU operands, f32 accumulation
    return jax.lax.dot_general(a.astype(jnp.bfloat16), b.astype(jnp.bfloat16),
                               (((1,), (1,)), ((), ())),
                               preferred_element_type=jnp.float32)


# ---------------------------------------------------------------- fused kernel (no grid)
def vit_kernel(patches_ref, cslab_ref, wslab_ref, o_ref):
    ns = patches_ref.shape[0]          # N * SEQ flattened tokens
    n = ns // SEQ

    # ---- patch embedding: channel repeat, conv bias, class token and pos-emb are all folded
    #      into cslab (class-token rows of `patches` are zero).
    conv_w = cslab_ref[C_CONV:C_CONV + PP, :HIDDEN]
    x = _mxdot(patches_ref[...], conv_w) + cslab_ref[C_ADD:C_ADD + ns, :HIDDEN]   # (NS, D) f32

    mask = cslab_ref[C_MASK:C_MASK + ns, :ns]          # block-diag over batch, f32

    # ---- encoder layers (static unroll)
    for l in range(LAYERS):
        wr = l * W_ROWS
        br = C_BIAS + 16 * l

        # -- multi-head self-attention: per-head weights -> no lane slicing / row stacking
        h1 = _ln(x)
        attn = None
        for hd in range(HEADS):
            r = wr + 3 * hd * HIDDEN
            q = _mxdot(h1, wslab_ref[r:r + HIDDEN, :HEAD_DIM]) \
                + cslab_ref[br + 3 * hd:br + 3 * hd + 1, :HEAD_DIM]       # scale pre-folded
            k = _mxdot(h1, wslab_ref[r + HIDDEN:r + 2 * HIDDEN, :HEAD_DIM]) \
                + cslab_ref[br + 3 * hd + 1:br + 3 * hd + 2, :HEAD_DIM]
            v = _mxdot(h1, wslab_ref[r + 2 * HIDDEN:r + 3 * HIDDEN, :HEAD_DIM]) \
                + cslab_ref[br + 3 * hd + 2:br + 3 * hd + 3, :HEAD_DIM]

            s = _mxdot_nt(q, k) + mask                                    # (NS, NS) f32
            s = s - jnp.max(s, axis=-1, keepdims=True)
            p = jnp.exp(s)
            p = p * pl.reciprocal(jnp.sum(p, axis=-1, keepdims=True), approx=True)
            ctx = _mxdot(p, v)                                            # (NS, HEAD_DIM)

            wo_h = wslab_ref[wr + W_O + hd * HEAD_DIM:
                             wr + W_O + (hd + 1) * HEAD_DIM, :HIDDEN]     # (HEAD_DIM, D)
            part = _mxdot(ctx, wo_h)                                      # (NS, D)
            attn = part if attn is None else attn + part

        x = x + attn + cslab_ref[br + 6:br + 7, :HIDDEN]

        # -- MLP (ln2 affine folded into W1/b1)
        h2 = _ln(x)
        m = _gelu(_mxdot(h2, wslab_ref[wr + W_1:wr + W_1 + HIDDEN, :MLP])
                  + cslab_ref[br + 7:br + 8, :MLP])
        x = x + _mxdot(m, wslab_ref[wr + W_2:wr + W_2 + MLP, :HIDDEN]) \
              + cslab_ref[br + 8:br + 9, :HIDDEN]

    # ---- class tokens (selection matmul, kept f32) + folded final-LN head + sigmoid
    cls_sel = cslab_ref[C_CLS:C_CLS + n, :ns]
    cls_tok = jnp.dot(cls_sel, x, preferred_element_type=jnp.float32)     # (N, D)
    hc = _ln(cls_tok)
    hw = cslab_ref[C_HEAD:C_HEAD + 1, :HIDDEN]                            # ln_w * head_w
    hb = cslab_ref[C_HEAD + 1:C_HEAD + 2, :1]                             # ln_b.head_w + head_b
    logits = jnp.sum(hc * hw, axis=-1, keepdims=True) + hb                # (N, 1)
    o_ref[...] = jnp.broadcast_to(jax.nn.sigmoid(logits), o_ref.shape)    # lane-dense store


# ---------------------------------------------------------------- wrapper (one launch)
@jax.jit
def vit_forward(x, wslab, cslab):
    # x: (N, 1, H, W) like the PyTorch module input; the 1->3 channel repeat is folded
    # into the conv weight inside cslab (all 3 channels identical -> sum over channels).
    n = x.shape[0]
    hp = wp = IMAGE_SIZE // PATCH
    p = x[:, 0].reshape(n, hp, PATCH, wp, PATCH).transpose(0, 1, 3, 2, 4)
    p = p.reshape(n, N_PATCH, PP)
    p = jnp.pad(p, ((0, 0), (1, 0), (0, 0)))            # zero row per class-token slot
    patches = p.reshape(n * SEQ, PP)

    out = pl.pallas_call(
        vit_kernel,
        out_shape=jax.ShapeDtypeStruct((n, LANES), jnp.float32),
    )(patches, cslab, wslab)
    return out[:, :1]


# ---------------------------------------------------------------- params: init + packing
def init_params(key):
    def nrm(k, shape, scale=0.02):
        return scale * jax.random.normal(k, shape, dtype=jnp.float32)

    k_conv, k_pos, k_head, k_layers = jax.random.split(key, 4)
    p = {}
    # conv_proj: Conv2d(3, D, kernel=P, stride=P); input = same image over 3 channels
    conv_w = nrm(k_conv, (HIDDEN, 3, PATCH, PATCH))
    p["conv_w"] = conv_w.sum(axis=1).reshape(HIDDEN, PP).T                # (P*P, D)
    p["conv_b"] = jnp.zeros((HIDDEN,), jnp.float32)
    p["cls"] = jnp.zeros((HIDDEN,), jnp.float32)                          # zero-init class token
    p["pos"] = nrm(k_pos, (SEQ, HIDDEN))
    p["ln_w"] = jnp.ones((HIDDEN,), jnp.float32)                          # encoder.ln
    p["ln_b"] = jnp.zeros((HIDDEN,), jnp.float32)
    p["head_w"] = nrm(k_head, (1, HIDDEN))                                # Linear(D, 1).weight
    p["head_b"] = jnp.zeros((1,), jnp.float32)

    p["layers"] = []
    for lk in jax.random.split(k_layers, LAYERS):
        ks = jax.random.split(lk, 4)
        p["layers"].append(dict(
            ln1_w=jnp.ones((HIDDEN,), jnp.float32), ln1_b=jnp.zeros((HIDDEN,), jnp.float32),
            in_proj_w=nrm(ks[0], (3 * HIDDEN, HIDDEN)),        # [q; k; v] rows (torch layout)
            in_proj_b=jnp.zeros((3 * HIDDEN,), jnp.float32),
            out_proj_w=nrm(ks[1], (HIDDEN, HIDDEN)),
            out_proj_b=jnp.zeros((HIDDEN,), jnp.float32),
            ln2_w=jnp.ones((HIDDEN,), jnp.float32), ln2_b=jnp.zeros((HIDDEN,), jnp.float32),
            w1=nrm(ks[2], (MLP, HIDDEN)), b1=jnp.zeros((MLP,), jnp.float32),
            w2=nrm(ks[3], (HIDDEN, MLP)), b2=jnp.zeros((HIDDEN,), jnp.float32),
        ))
    return p


def pack_params(p, batch):
    """Fold LN affines / 1/sqrt(d) / channel repeat into weights and pack everything into:
       wslab (LAYERS*320, 128) bf16 and cslab (144, 128) f32."""
    ns = batch * SEQ
    assert ns <= 16 and batch <= 8, "constant-slab layout sized for small batch"
    scale = 1.0 / math.sqrt(HEAD_DIM)

    wslab = jnp.zeros((LAYERS * W_ROWS, LANES), jnp.float32)
    cslab = jnp.zeros((C_ROWS, LANES), jnp.float32)

    for l, lay in enumerate(p["layers"]):
        base = l * W_ROWS
        br = C_BIAS + 16 * l
        wq_f = lay["in_proj_w"][0:HIDDEN].T                # (D, D)
        wk_f = lay["in_proj_w"][HIDDEN:2 * HIDDEN].T
        wv_f = lay["in_proj_w"][2 * HIDDEN:].T
        wo_f = lay["out_proj_w"].T
        bq_f = lay["ln1_b"] @ wq_f + lay["in_proj_b"][0:HIDDEN]
        bk_f = lay["ln1_b"] @ wk_f + lay["in_proj_b"][HIDDEN:2 * HIDDEN]
        bv_f = lay["ln1_b"] @ wv_f + lay["in_proj_b"][2 * HIDDEN:]
        d1 = lay["ln1_w"][:, None]
        for h in range(HEADS):
            c0, c1 = h * HEAD_DIM, (h + 1) * HEAD_DIM
            r = base + 3 * h * HIDDEN
            wslab = wslab.at[r:r + HIDDEN, :HEAD_DIM].set(d1 * wq_f[:, c0:c1] * scale)
            wslab = wslab.at[r + HIDDEN:r + 2 * HIDDEN, :HEAD_DIM].set(d1 * wk_f[:, c0:c1])
            wslab = wslab.at[r + 2 * HIDDEN:r + 3 * HIDDEN, :HEAD_DIM].set(d1 * wv_f[:, c0:c1])
            wslab = wslab.at[base + W_O + h * HEAD_DIM:
                             base + W_O + (h + 1) * HEAD_DIM, :HIDDEN].set(wo_f[c0:c1, :])
            cslab = cslab.at[br + 3 * h, :HEAD_DIM].set(bq_f[c0:c1] * scale)
            cslab = cslab.at[br + 3 * h + 1, :HEAD_DIM].set(bk_f[c0:c1])
            cslab = cslab.at[br + 3 * h + 2, :HEAD_DIM].set(bv_f[c0:c1])
        d2 = lay["ln2_w"][:, None]
        wslab = wslab.at[base + W_1:base + W_1 + HIDDEN, :MLP].set(d2 * lay["w1"].T)
        wslab = wslab.at[base + W_2:base + W_2 + MLP, :HIDDEN].set(lay["w2"].T)
        cslab = cslab.at[br + 6, :HIDDEN].set(lay["out_proj_b"])
        cslab = cslab.at[br + 7, :MLP].set(lay["ln2_b"] @ lay["w1"].T + lay["b1"])
        cslab = cslab.at[br + 8, :HIDDEN].set(lay["b2"])

    cslab = cslab.at[C_CONV:C_CONV + PP, :HIDDEN].set(p["conv_w"])
    add = jnp.concatenate([(p["cls"] + p["pos"][0])[None, :],
                           p["conv_b"][None, :] + p["pos"][1:]], axis=0)   # (SEQ, D)
    cslab = cslab.at[C_ADD:C_ADD + ns, :HIDDEN].set(jnp.tile(add, (batch, 1)))
    blk = jnp.arange(ns) // SEQ
    attn_mask = jnp.where(blk[:, None] == blk[None, :], 0.0, -1e30).astype(jnp.float32)
    cslab = cslab.at[C_MASK:C_MASK + ns, :ns].set(attn_mask)
    sel = jnp.zeros((batch, ns), jnp.float32).at[
        jnp.arange(batch), jnp.arange(batch) * SEQ].set(1.0)
    cslab = cslab.at[C_CLS:C_CLS + batch, :ns].set(sel)
    cslab = cslab.at[C_HEAD, :HIDDEN].set(p["ln_w"] * p["head_w"][0])
    cslab = cslab.at[C_HEAD + 1, 0].set(jnp.dot(p["ln_b"], p["head_w"][0]) + p["head_b"][0])

    return wslab.astype(jnp.bfloat16), cslab


# ---------------------------------------------------------------- main
if __name__ == "__main__":
    key = jax.random.PRNGKey(0)
    k_params, k_x = jax.random.split(key)
    params = init_params(k_params)
    wslab, cslab = pack_params(params, BATCH)

    x = jax.random.normal(k_x, (BATCH, 1, IMAGE_SIZE, IMAGE_SIZE), dtype=jnp.float32)

    out = vit_forward(x, wslab, cslab)
    out = jax.block_until_ready(out)
    assert out.shape == (BATCH, 1)
    assert bool(jnp.all(jnp.isfinite(out)))
    assert bool(jnp.all((out >= 0.0) & (out <= 1.0)))   # sigmoid output range
    print("KERNEL_OK")
</pallas_src>

<mosaic_0001>
module attributes {stable_mosaic.version = 11 : i64} {
  func.func @vit_kernel(%arg0: memref<10x64xf32, #tpu.memory_space<vmem>>, %arg1: memref<144x128xf32, #tpu.memory_space<vmem>>, %arg2: memref<640x128xbf16, #tpu.memory_space<vmem>>, %arg3: memref<2x128xf32, #tpu.memory_space<vmem>>) attributes {dimension_semantics = [], scalar_prefetch = 0 : i64, scratch_operands = 0 : i64, tpu.core_type = #tpu.core_type<tc>} {
    %c0 = arith.constant 0 : index
    %c0_0 = arith.constant 0 : index
    %0 = vector.load %arg1[%c0, %c0_0] : memref<144x128xf32, #tpu.memory_space<vmem>>, vector<64x32xf32>
    %c0_1 = arith.constant 0 : index
    %c0_2 = arith.constant 0 : index
    %1 = vector.load %arg0[%c0_1, %c0_2] : memref<10x64xf32, #tpu.memory_space<vmem>>, vector<10x64xf32>
    %2 = arith.truncf %1 : vector<10x64xf32> to vector<10x64xbf16>
    %3 = arith.truncf %0 : vector<64x32xf32> to vector<64x32xbf16>
    %cst = arith.constant dense<0.000000e+00> : vector<10x32xf32>
    %4 = tpu.matmul %2, %3, %cst {dimension_numbers = #tpu.dot_dimension_numbers<[1], [0], [0], [1], [0, 0, 1, 1], [], []>} : vector<10x64xbf16>, vector<64x32xbf16>, vector<10x32xf32> -> vector<10x32xf32>
    %c64 = arith.constant 64 : index
    %c0_3 = arith.constant 0 : index
    %5 = vector.load %arg1[%c64, %c0_3] : memref<144x128xf32, #tpu.memory_space<vmem>>, vector<10x32xf32>
    %6 = arith.addf %4, %5 : vector<10x32xf32>
    %c80 = arith.constant 80 : index
    %c0_4 = arith.constant 0 : index
    %7 = vector.load %arg1[%c80, %c0_4] : memref<144x128xf32, #tpu.memory_space<vmem>>, vector<10x10xf32>
    %cst_5 = arith.constant dense<0.000000e+00> : vector<10xf32>
    %8 = vector.multi_reduction <add>, %6, %cst_5 [1] : vector<10x32xf32> to vector<10xf32>
    %9 = vector.shape_cast %8 : vector<10xf32> to vector<10x1xf32>
    %cst_6 = arith.constant 3.200000e+01 : f32
    %10 = vector.broadcast %cst_6 : f32 to vector<10x1xf32>
    %11 = arith.divf %9, %10 : vector<10x1xf32>
    %12 = vector.broadcast %11 : vector<10x1xf32> to vector<10x32xf32>
    %13 = arith.subf %6, %12 : vector<10x32xf32>
    %14 = arith.mulf %13, %13 : vector<10x32xf32>
    %cst_7 = arith.constant dense<0.000000e+00> : vector<10xf32>
    %15 = vector.multi_reduction <add>, %14, %cst_7 [1] : vector<10x32xf32> to vector<10xf32>
    %16 = vector.shape_cast %15 : vector<10xf32> to vector<10x1xf32>
    %cst_8 = arith.constant 3.200000e+01 : f32
    %17 = vector.broadcast %cst_8 : f32 to vector<10x1xf32>
    %18 = arith.divf %16, %17 : vector<10x1xf32>
    %cst_9 = arith.constant 9.99999997E-7 : f32
    %19 = vector.broadcast %cst_9 : f32 to vector<10x1xf32>
    %20 = arith.addf %18, %19 : vector<10x1xf32>
    %21 = math.rsqrt %20 : vector<10x1xf32>
    %22 = vector.broadcast %21 : vector<10x1xf32> to vector<10x32xf32>
    %23 = arith.mulf %13, %22 : vector<10x32xf32>
    %c0_10 = arith.constant 0 : index
    %c0_11 = arith.constant 0 : index
    %24 = vector.load %arg2[%c0_10, %c0_11] : memref<640x128xbf16, #tpu.memory_space<vmem>>, vector<32x16xbf16>
    %25 = arith.truncf %23 : vector<10x32xf32> to vector<10x32xbf16>
    %cst_12 = arith.constant dense<0.000000e+00> : vector<10x16xf32>
    %26 = tpu.matmul %25, %24, %cst_12 {dimension_numbers = #tpu.dot_dimension_numbers<[1], [0], [0], [1], [0, 0, 1, 1], [], []>} : vector<10x32xbf16>, vector<32x16xbf16>, vector<10x16xf32> -> vector<10x16xf32>
    %c112 = arith.constant 112 : index
    %c0_13 = arith.constant 0 : index
    %27 = vector.load %arg1[%c112, %c0_13] : memref<144x128xf32, #tpu.memory_space<vmem>>, vector<1x16xf32>
    %28 = vector.broadcast %27 : vector<1x16xf32> to vector<10x16xf32>
    %29 = arith.addf %26, %28 : vector<10x16xf32>
    %c32 = arith.constant 32 : index
    %c0_14 = arith.constant 0 : index
    %30 = vector.load %arg2[%c32, %c0_14] : memref<640x128xbf16, #tpu.memory_space<vmem>>, vector<32x16xbf16>
    %31 = arith.truncf %23 : vector<10x32xf32> to vector<10x32xbf16>
    %cst_15 = arith.constant dense<0.000000e+00> : vector<10x16xf32>
    %32 = tpu.matmul %31, %30, %cst_15 {dimension_numbers = #tpu.dot_dimension_numbers<[1], [0], [0], [1], [0, 0, 1, 1], [], []>} : vector<10x32xbf16>, vector<32x16xbf16>, vector<10x16xf32> -> vector<10x16xf32>
    %c113 = arith.constant 113 : index
    %c0_16 = arith.constant 0 : index
    %33 = vector.load %arg1[%c113, %c0_16] : memref<144x128xf32, #tpu.memory_space<vmem>>, vector<1x16xf32>
    %34 = vector.broadcast %33 : vector<1x16xf32> to vector<10x16xf32>
    %35 = arith.addf %32, %34 : vector<10x16xf32>
    %c64_17 = arith.constant 64 : index
    %c0_18 = arith.constant 0 : index
    %36 = vector.load %arg2[%c64_17, %c0_18] : memref<640x128xbf16, #tpu.memory_space<vmem>>, vector<32x16xbf16>
    %37 = arith.truncf %23 : vector<10x32xf32> to vector<10x32xbf16>
    %cst_19 = arith.constant dense<0.000000e+00> : vector<10x16xf32>
    %38 = tpu.matmul %37, %36, %cst_19 {dimension_numbers = #tpu.dot_dimension_numbers<[1], [0], [0], [1], [0, 0, 1, 1], [], []>} : vector<10x32xbf16>, vector<32x16xbf16>, vector<10x16xf32> -> vector<10x16xf32>
    %c114 = arith.constant 114 : index
    %c0_20 = arith.constant 0 : index
    %39 = vector.load %arg1[%c114, %c0_20] : memref<144x128xf32, #tpu.memory_space<vmem>>, vector<1x16xf32>
    %40 = vector.broadcast %39 : vector<1x16xf32> to vector<10x16xf32>
    %41 = arith.addf %38, %40 : vector<10x16xf32>
    %42 = arith.truncf %29 : vector<10x16xf32> to vector<10x16xbf16>
    %43 = arith.truncf %35 : vector<10x16xf32> to vector<10x16xbf16>
    %cst_21 = arith.constant dense<0.000000e+00> : vector<10x10xf32>
    %44 = tpu.matmul %42, %43, %cst_21 {dimension_numbers = #tpu.dot_dimension_numbers<[1], [1], [0], [0], [0, 0, 1, 0], [], []>} : vector<10x16xbf16>, vector<10x16xbf16>, vector<10x10xf32> -> vector<10x10xf32>
    %45 = arith.addf %44, %7 : vector<10x10xf32>
    %cst_22 = arith.constant dense<0xFF800000> : vector<10xf32>
    %46 = vector.multi_reduction <maximumf>, %45, %cst_22 [1] : vector<10x10xf32> to vector<10xf32>
    %47 = vector.shape_cast %46 : vector<10xf32> to vector<10x1xf32>
    %48 = vector.broadcast %47 : vector<10x1xf32> to vector<10x10xf32>
    %49 = arith.subf %45, %48 : vector<10x10xf32>
    %50 = math.exp %49 : vector<10x10xf32>
    %cst_23 = arith.constant dense<0.000000e+00> : vector<10xf32>
    %51 = vector.multi_reduction <add>, %50, %cst_23 [1] : vector<10x10xf32> to vector<10xf32>
    %52 = vector.shape_cast %51 : vector<10xf32> to vector<10x1xf32>
    %53 = tpu.reciprocal %52 {approx = true} : vector<10x1xf32> -> vector<10x1xf32>
    %54 = vector.broadcast %53 : vector<10x1xf32> to vector<10x10xf32>
    %55 = arith.mulf %50, %54 : vector<10x10xf32>
    %56 = arith.truncf %55 : vector<10x10xf32> to vector<10x10xbf16>
    %57 = arith.truncf %41 : vector<10x16xf32> to vector<10x16xbf16>
    %cst_24 = arith.constant dense<0.000000e+00> : vector<10x16xf32>
    %58 = tpu.matmul %56, %57, %cst_24 {dimension_numbers = #tpu.dot_dimension_numbers<[1], [0], [0], [1], [0, 0, 1, 1], [], []>} : vector<10x10xbf16>, vector<10x16xbf16>, vector<10x16xf32> -> vector<10x16xf32>
    %c192 = arith.constant 192 : index
    %c0_25 = arith.constant 0 : index
    %59 = vector.load %arg2[%c192, %c0_25] : memref<640x128xbf16, #tpu.memory_space<vmem>>, vector<16x32xbf16>
    %60 = arith.truncf %58 : vector<10x16xf32> to vector<10x16xbf16>
    %cst_26 = arith.constant dense<0.000000e+00> : vector<10x32xf32>
    %61 = tpu.matmul %60, %59, %cst_26 {dimension_numbers = #tpu.dot_dimension_numbers<[1], [0], [0], [1], [0, 0, 1, 1], [], []>} : vector<10x16xbf16>, vector<16x32xbf16>, vector<10x32xf32> -> vector<10x32xf32>
    %c96 = arith.constant 96 : index
    %c0_27 = arith.constant 0 : index
    %62 = vector.load %arg2[%c96, %c0_27] : memref<640x128xbf16, #tpu.memory_space<vmem>>, vector<32x16xbf16>
    %63 = arith.truncf %23 : vector<10x32xf32> to vector<10x32xbf16>
    %cst_28 = arith.constant dense<0.000000e+00> : vector<10x16xf32>
    %64 = tpu.matmul %63, %62, %cst_28 {dimension_numbers = #tpu.dot_dimension_numbers<[1], [0], [0], [1], [0, 0, 1, 1], [], []>} : vector<10x32xbf16>, vector<32x16xbf16>, vector<10x16xf32> -> vector<10x16xf32>
    %c115 = arith.constant 115 : index
    %c0_29 = arith.constant 0 : index
    %65 = vector.load %arg1[%c115, %c0_29] : memref<144x128xf32, #tpu.memory_space<vmem>>, vector<1x16xf32>
    %66 = vector.broadcast %65 : vector<1x16xf32> to vector<10x16xf32>
    %67 = arith.addf %64, %66 : vector<10x16xf32>
    %c128 = arith.constant 128 : index
    %c0_30 = arith.constant 0 : index
    %68 = vector.load %arg2[%c128, %c0_30] : memref<640x128xbf16, #tpu.memory_space<vmem>>, vector<32x16xbf16>
    %69 = arith.truncf %23 : vector<10x32xf32> to vector<10x32xbf16>
    %cst_31 = arith.constant dense<0.000000e+00> : vector<10x16xf32>
    %70 = tpu.matmul %69, %68, %cst_31 {dimension_numbers = #tpu.dot_dimension_numbers<[1], [0], [0], [1], [0, 0, 1, 1], [], []>} : vector<10x32xbf16>, vector<32x16xbf16>, vector<10x16xf32> -> vector<10x16xf32>
    %c116 = arith.constant 116 : index
    %c0_32 = arith.constant 0 : index
    %71 = vector.load %arg1[%c116, %c0_32] : memref<144x128xf32, #tpu.memory_space<vmem>>, vector<1x16xf32>
    %72 = vector.broadcast %71 : vector<1x16xf32> to vector<10x16xf32>
    %73 = arith.addf %70, %72 : vector<10x16xf32>
    %c160 = arith.constant 160 : index
    %c0_33 = arith.constant 0 : index
    %74 = vector.load %arg2[%c160, %c0_33] : memref<640x128xbf16, #tpu.memory_space<vmem>>, vector<32x16xbf16>
    %75 = arith.truncf %23 : vector<10x32xf32> to vector<10x32xbf16>
    %cst_34 = arith.constant dense<0.000000e+00> : vector<10x16xf32>
    %76 = tpu.matmul %75, %74, %cst_34 {dimension_numbers = #tpu.dot_dimension_numbers<[1], [0], [0], [1], [0, 0, 1, 1], [], []>} : vector<10x32xbf16>, vector<32x16xbf16>, vector<10x16xf32> -> vector<10x16xf32>
    %c117 = arith.constant 117 : index
    %c0_35 = arith.constant 0 : index
    %77 = vector.load %arg1[%c117, %c0_35] : memref<144x128xf32, #tpu.memory_space<vmem>>, vector<1x16xf32>
    %78 = vector.broadcast %77 : vector<1x16xf32> to vector<10x16xf32>
    %79 = arith.addf %76, %78 : vector<10x16xf32>
    %80 = arith.truncf %67 : vector<10x16xf32> to vector<10x16xbf16>
    %81 = arith.truncf %73 : vector<10x16xf32> to vector<10x16xbf16>
    %cst_36 = arith.constant dense<0.000000e+00> : vector<10x10xf32>
    %82 = tpu.matmul %80, %81, %cst_36 {dimension_numbers = #tpu.dot_dimension_numbers<[1], [1], [0], [0], [0, 0, 1, 0], [], []>} : vector<10x16xbf16>, vector<10x16xbf16>, vector<10x10xf32> -> vector<10x10xf32>
    %83 = arith.addf %82, %7 : vector<10x10xf32>
    %cst_37 = arith.constant dense<0xFF800000> : vector<10xf32>
    %84 = vector.multi_reduction <maximumf>, %83, %cst_37 [1] : vector<10x10xf32> to vector<10xf32>
    %85 = vector.shape_cast %84 : vector<10xf32> to vector<10x1xf32>
    %86 = vector.broadcast %85 : vector<10x1xf32> to vector<10x10xf32>
    %87 = arith.subf %83, %86 : vector<10x10xf32>
    %88 = math.exp %87 : vector<10x10xf32>
    %cst_38 = arith.constant dense<0.000000e+00> : vector<10xf32>
    %89 = vector.multi_reduction <add>, %88, %cst_38 [1] : vector<10x10xf32> to vector<10xf32>
    %90 = vector.shape_cast %89 : vector<10xf32> to vector<10x1xf32>
    %91 = tpu.reciprocal %90 {approx = true} : vector<10x1xf32> -> vector<10x1xf32>
    %92 = vector.broadcast %91 : vector<10x1xf32> to vector<10x10xf32>
    %93 = arith.mulf %88, %92 : vector<10x10xf32>
    %94 = arith.truncf %93 : vector<10x10xf32> to vector<10x10xbf16>
    %95 = arith.truncf %79 : vector<10x16xf32> to vector<10x16xbf16>
    %cst_39 = arith.constant dense<0.000000e+00> : vector<10x16xf32>
    %96 = tpu.matmul %94, %95, %cst_39 {dimension_numbers = #tpu.dot_dimension_numbers<[1], [0], [0], [1], [0, 0, 1, 1], [], []>} : vector<10x10xbf16>, vector<10x16xbf16>, vector<10x16xf32> -> vector<10x16xf32>
    %c208 = arith.constant 208 : index
    %c0_40 = arith.constant 0 : index
    %97 = vector.load %arg2[%c208, %c0_40] : memref<640x128xbf16, #tpu.memory_space<vmem>>, vector<16x32xbf16>
    %98 = arith.truncf %96 : vector<10x16xf32> to vector<10x16xbf16>
    %cst_41 = arith.constant dense<0.000000e+00> : vector<10x32xf32>
    %99 = tpu.matmul %98, %97, %cst_41 {dimension_numbers = #tpu.dot_dimension_numbers<[1], [0], [0], [1], [0, 0, 1, 1], [], []>} : vector<10x16xbf16>, vector<16x32xbf16>, vector<10x32xf32> -> vector<10x32xf32>
    %100 = arith.addf %61, %99 : vector<10x32xf32>
    %101 = arith.addf %6, %100 : vector<10x32xf32>
    %c118 = arith.constant 118 : index
    %c0_42 = arith.constant 0 : index
    %102 = vector.load %arg1[%c118, %c0_42] : memref<144x128xf32, #tpu.memory_space<vmem>>, vector<1x32xf32>
    %103 = vector.broadcast %102 : vector<1x32xf32> to vector<10x32xf32>
    %104 = arith.addf %101, %103 : vector<10x32xf32>
    %cst_43 = arith.constant dense<0.000000e+00> : vector<10xf32>
    %105 = vector.multi_reduction <add>, %104, %cst_43 [1] : vector<10x32xf32> to vector<10xf32>
    %106 = vector.shape_cast %105 : vector<10xf32> to vector<10x1xf32>
    %cst_44 = arith.constant 3.200000e+01 : f32
    %107 = vector.broadcast %cst_44 : f32 to vector<10x1xf32>
    %108 = arith.divf %106, %107 : vector<10x1xf32>
    %109 = vector.broadcast %108 : vector<10x1xf32> to vector<10x32xf32>
    %110 = arith.subf %104, %109 : vector<10x32xf32>
    %111 = arith.mulf %110, %110 : vector<10x32xf32>
    %cst_45 = arith.constant dense<0.000000e+00> : vector<10xf32>
    %112 = vector.multi_reduction <add>, %111, %cst_45 [1] : vector<10x32xf32> to vector<10xf32>
    %113 = vector.shape_cast %112 : vector<10xf32> to vector<10x1xf32>
    %cst_46 = arith.constant 3.200000e+01 : f32
    %114 = vector.broadcast %cst_46 : f32 to vector<10x1xf32>
    %115 = arith.divf %113, %114 : vector<10x1xf32>
    %cst_47 = arith.constant 9.99999997E-7 : f32
    %116 = vector.broadcast %cst_47 : f32 to vector<10x1xf32>
    %117 = arith.addf %115, %116 : vector<10x1xf32>
    %118 = math.rsqrt %117 : vector<10x1xf32>
    %119 = vector.broadcast %118 : vector<10x1xf32> to vector<10x32xf32>
    %120 = arith.mulf %110, %119 : vector<10x32xf32>
    %c224 = arith.constant 224 : index
    %c0_48 = arith.constant 0 : index
    %121 = vector.load %arg2[%c224, %c0_48] : memref<640x128xbf16, #tpu.memory_space<vmem>>, vector<32x64xbf16>
    %122 = arith.truncf %120 : vector<10x32xf32> to vector<10x32xbf16>
    %cst_49 = arith.constant dense<0.000000e+00> : vector<10x64xf32>
    %123 = tpu.matmul %122, %121, %cst_49 {dimension_numbers = #tpu.dot_dimension_numbers<[1], [0], [0], [1], [0, 0, 1, 1], [], []>} : vector<10x32xbf16>, vector<32x64xbf16>, vector<10x64xf32> -> vector<10x64xf32>
    %c119 = arith.constant 119 : index
    %c0_50 = arith.constant 0 : index
    %124 = vector.load %arg1[%c119, %c0_50] : memref<144x128xf32, #tpu.memory_space<vmem>>, vector<1x64xf32>
    %125 = vector.broadcast %124 : vector<1x64xf32> to vector<10x64xf32>
    %126 = arith.addf %123, %125 : vector<10x64xf32>
    %cst_51 = arith.constant 5.000000e-01 : f32
    %127 = vector.broadcast %cst_51 : f32 to vector<10x64xf32>
    %128 = arith.mulf %127, %126 : vector<10x64xf32>
    %cst_52 = arith.constant 0.707106769 : f32
    %129 = vector.broadcast %cst_52 : f32 to vector<10x64xf32>
    %130 = arith.mulf %126, %129 : vector<10x64xf32>
    %131 = math.erf %130 : vector<10x64xf32>
    %cst_53 = arith.constant 1.000000e+00 : f32
    %132 = vector.broadcast %cst_53 : f32 to vector<10x64xf32>
    %133 = arith.addf %132, %131 : vector<10x64xf32>
    %134 = arith.mulf %128, %133 : vector<10x64xf32>
    %c256 = arith.constant 256 : index
    %c0_54 = arith.constant 0 : index
    %135 = vector.load %arg2[%c256, %c0_54] : memref<640x128xbf16, #tpu.memory_space<vmem>>, vector<64x32xbf16>
    %136 = arith.truncf %134 : vector<10x64xf32> to vector<10x64xbf16>
    %cst_55 = arith.constant dense<0.000000e+00> : vector<10x32xf32>
    %137 = tpu.matmul %136, %135, %cst_55 {dimension_numbers = #tpu.dot_dimension_numbers<[1], [0], [0], [1], [0, 0, 1, 1], [], []>} : vector<10x64xbf16>, vector<64x32xbf16>, vector<10x32xf32> -> vector<10x32xf32>
    %138 = arith.addf %104, %137 : vector<10x32xf32>
    %c120 = arith.constant 120 : index
    %c0_56 = arith.constant 0 : index
    %139 = vector.load %arg1[%c120, %c0_56] : memref<144x128xf32, #tpu.memory_space<vmem>>, vector<1x32xf32>
    %140 = vector.broadcast %139 : vector<1x32xf32> to vector<10x32xf32>
    %141 = arith.addf %138, %140 : vector<10x32xf32>
    %cst_57 = arith.constant dense<0.000000e+00> : vector<10xf32>
    %142 = vector.multi_reduction <add>, %141, %cst_57 [1] : vector<10x32xf32> to vector<10xf32>
    %143 = vector.shape_cast %142 : vector<10xf32> to vector<10x1xf32>
    %cst_58 = arith.constant 3.200000e+01 : f32
    %144 = vector.broadcast %cst_58 : f32 to vector<10x1xf32>
    %145 = arith.divf %143, %144 : vector<10x1xf32>
    %146 = vector.broadcast %145 : vector<10x1xf32> to vector<10x32xf32>
    %147 = arith.subf %141, %146 : vector<10x32xf32>
    %148 = arith.mulf %147, %147 : vector<10x32xf32>
    %cst_59 = arith.constant dense<0.000000e+00> : vector<10xf32>
    %149 = vector.multi_reduction <add>, %148, %cst_59 [1] : vector<10x32xf32> to vector<10xf32>
    %150 = vector.shape_cast %149 : vector<10xf32> to vector<10x1xf32>
    %cst_60 = arith.constant 3.200000e+01 : f32
    %151 = vector.broadcast %cst_60 : f32 to vector<10x1xf32>
    %152 = arith.divf %150, %151 : vector<10x1xf32>
    %cst_61 = arith.constant 9.99999997E-7 : f32
    %153 = vector.broadcast %cst_61 : f32 to vector<10x1xf32>
    %154 = arith.addf %152, %153 : vector<10x1xf32>
    %155 = math.rsqrt %154 : vector<10x1xf32>
    %156 = vector.broadcast %155 : vector<10x1xf32> to vector<10x32xf32>
    %157 = arith.mulf %147, %156 : vector<10x32xf32>
    %c320 = arith.constant 320 : index
    %c0_62 = arith.constant 0 : index
    %158 = vector.load %arg2[%c320, %c0_62] : memref<640x128xbf16, #tpu.memory_space<vmem>>, vector<32x16xbf16>
    %159 = arith.truncf %157 : vector<10x32xf32> to vector<10x32xbf16>
    %cst_63 = arith.constant dense<0.000000e+00> : vector<10x16xf32>
    %160 = tpu.matmul %159, %158, %cst_63 {dimension_numbers = #tpu.dot_dimension_numbers<[1], [0], [0], [1], [0, 0, 1, 1], [], []>} : vector<10x32xbf16>, vector<32x16xbf16>, vector<10x16xf32> -> vector<10x16xf32>
    %c128_64 = arith.constant 128 : index
    %c0_65 = arith.constant 0 : index
    %161 = vector.load %arg1[%c128_64, %c0_65] : memref<144x128xf32, #tpu.memory_space<vmem>>, vector<1x16xf32>
    %162 = vector.broadcast %161 : vector<1x16xf32> to vector<10x16xf32>
    %163 = arith.addf %160, %162 : vector<10x16xf32>
    %c352 = arith.constant 352 : index
    %c0_66 = arith.constant 0 : index
    %164 = vector.load %arg2[%c352, %c0_66] : memref<640x128xbf16, #tpu.memory_space<vmem>>, vector<32x16xbf16>
    %165 = arith.truncf %157 : vector<10x32xf32> to vector<10x32xbf16>
    %cst_67 = arith.constant dense<0.000000e+00> : vector<10x16xf32>
    %166 = tpu.matmul %165, %164, %cst_67 {dimension_numbers = #tpu.dot_dimension_numbers<[1], [0], [0], [1], [0, 0, 1, 1], [], []>} : vector<10x32xbf16>, vector<32x16xbf16>, vector<10x16xf32> -> vector<10x16xf32>
    %c129 = arith.constant 129 : index
    %c0_68 = arith.constant 0 : index
    %167 = vector.load %arg1[%c129, %c0_68] : memref<144x128xf32, #tpu.memory_space<vmem>>, vector<1x16xf32>
    %168 = vector.broadcast %167 : vector<1x16xf32> to vector<10x16xf32>
    %169 = arith.addf %166, %168 : vector<10x16xf32>
    %c384 = arith.constant 384 : index
    %c0_69 = arith.constant 0 : index
    %170 = vector.load %arg2[%c384, %c0_69] : memref<640x128xbf16, #tpu.memory_space<vmem>>, vector<32x16xbf16>
    %171 = arith.truncf %157 : vector<10x32xf32> to vector<10x32xbf16>
    %cst_70 = arith.constant dense<0.000000e+00> : vector<10x16xf32>
    %172 = tpu.matmul %171, %170, %cst_70 {dimension_numbers = #tpu.dot_dimension_numbers<[1], [0], [0], [1], [0, 0, 1, 1], [], []>} : vector<10x32xbf16>, vector<32x16xbf16>, vector<10x16xf32> -> vector<10x16xf32>
    %c130 = arith.constant 130 : index
    %c0_71 = arith.constant 0 : index
    %173 = vector.load %arg1[%c130, %c0_71] : memref<144x128xf32, #tpu.memory_space<vmem>>, vector<1x16xf32>
    %174 = vector.broadcast %173 : vector<1x16xf32> to vector<10x16xf32>
    %175 = arith.addf %172, %174 : vector<10x16xf32>
    %176 = arith.truncf %163 : vector<10x16xf32> to vector<10x16xbf16>
    %177 = arith.truncf %169 : vector<10x16xf32> to vector<10x16xbf16>
    %cst_72 = arith.constant dense<0.000000e+00> : vector<10x10xf32>
    %178 = tpu.matmul %176, %177, %cst_72 {dimension_numbers = #tpu.dot_dimension_numbers<[1], [1], [0], [0], [0, 0, 1, 0], [], []>} : vector<10x16xbf16>, vector<10x16xbf16>, vector<10x10xf32> -> vector<10x10xf32>
    %179 = arith.addf %178, %7 : vector<10x10xf32>
    %cst_73 = arith.constant dense<0xFF800000> : vector<10xf32>
    %180 = vector.multi_reduction <maximumf>, %179, %cst_73 [1] : vector<10x10xf32> to vector<10xf32>
    %181 = vector.shape_cast %180 : vector<10xf32> to vector<10x1xf32>
    %182 = vector.broadcast %181 : vector<10x1xf32> to vector<10x10xf32>
    %183 = arith.subf %179, %182 : vector<10x10xf32>
    %184 = math.exp %183 : vector<10x10xf32>
    %cst_74 = arith.constant dense<0.000000e+00> : vector<10xf32>
    %185 = vector.multi_reduction <add>, %184, %cst_74 [1] : vector<10x10xf32> to vector<10xf32>
    %186 = vector.shape_cast %185 : vector<10xf32> to vector<10x1xf32>
    %187 = tpu.reciprocal %186 {approx = true} : vector<10x1xf32> -> vector<10x1xf32>
    %188 = vector.broadcast %187 : vector<10x1xf32> to vector<10x10xf32>
    %189 = arith.mulf %184, %188 : vector<10x10xf32>
    %190 = arith.truncf %189 : vector<10x10xf32> to vector<10x10xbf16>
    %191 = arith.truncf %175 : vector<10x16xf32> to vector<10x16xbf16>
    %cst_75 = arith.constant dense<0.000000e+00> : vector<10x16xf32>
    %192 = tpu.matmul %190, %191, %cst_75 {dimension_numbers = #tpu.dot_dimension_numbers<[1], [0], [0], [1], [0, 0, 1, 1], [], []>} : vector<10x10xbf16>, vector<10x16xbf16>, vector<10x16xf32> -> vector<10x16xf32>
    %c512 = arith.constant 512 : index
    %c0_76 = arith.constant 0 : index
    %193 = vector.load %arg2[%c512, %c0_76] : memref<640x128xbf16, #tpu.memory_space<vmem>>, vector<16x32xbf16>
    %194 = arith.truncf %192 : vector<10x16xf32> to vector<10x16xbf16>
    %cst_77 = arith.constant dense<0.000000e+00> : vector<10x32xf32>
    %195 = tpu.matmul %194, %193, %cst_77 {dimension_numbers = #tpu.dot_dimension_numbers<[1], [0], [0], [1], [0, 0, 1, 1], [], []>} : vector<10x16xbf16>, vector<16x32xbf16>, vector<10x32xf32> -> vector<10x32xf32>
    %c416 = arith.constant 416 : index
    %c0_78 = arith.constant 0 : index
    %196 = vector.load %arg2[%c416, %c0_78] : memref<640x128xbf16, #tpu.memory_space<vmem>>, vector<32x16xbf16>
    %197 = arith.truncf %157 : vector<10x32xf32> to vector<10x32xbf16>
    %cst_79 = arith.constant dense<0.000000e+00> : vector<10x16xf32>
    %198 = tpu.matmul %197, %196, %cst_79 {dimension_numbers = #tpu.dot_dimension_numbers<[1], [0], [0], [1], [0, 0, 1, 1], [], []>} : vector<10x32xbf16>, vector<32x16xbf16>, vector<10x16xf32> -> vector<10x16xf32>
    %c131 = arith.constant 131 : index
    %c0_80 = arith.constant 0 : index
    %199 = vector.load %arg1[%c131, %c0_80] : memref<144x128xf32, #tpu.memory_space<vmem>>, vector<1x16xf32>
    %200 = vector.broadcast %199 : vector<1x16xf32> to vector<10x16xf32>
    %201 = arith.addf %198, %200 : vector<10x16xf32>
    %c448 = arith.constant 448 : index
    %c0_81 = arith.constant 0 : index
    %202 = vector.load %arg2[%c448, %c0_81] : memref<640x128xbf16, #tpu.memory_space<vmem>>, vector<32x16xbf16>
    %203 = arith.truncf %157 : vector<10x32xf32> to vector<10x32xbf16>
    %cst_82 = arith.constant dense<0.000000e+00> : vector<10x16xf32>
    %204 = tpu.matmul %203, %202, %cst_82 {dimension_numbers = #tpu.dot_dimension_numbers<[1], [0], [0], [1], [0, 0, 1, 1], [], []>} : vector<10x32xbf16>, vector<32x16xbf16>, vector<10x16xf32> -> vector<10x16xf32>
    %c132 = arith.constant 132 : index
    %c0_83 = arith.constant 0 : index
    %205 = vector.load %arg1[%c132, %c0_83] : memref<144x128xf32, #tpu.memory_space<vmem>>, vector<1x16xf32>
    %206 = vector.broadcast %205 : vector<1x16xf32> to vector<10x16xf32>
    %207 = arith.addf %204, %206 : vector<10x16xf32>
    %c480 = arith.constant 480 : index
    %c0_84 = arith.constant 0 : index
    %208 = vector.load %arg2[%c480, %c0_84] : memref<640x128xbf16, #tpu.memory_space<vmem>>, vector<32x16xbf16>
    %209 = arith.truncf %157 : vector<10x32xf32> to vector<10x32xbf16>
    %cst_85 = arith.constant dense<0.000000e+00> : vector<10x16xf32>
    %210 = tpu.matmul %209, %208, %cst_85 {dimension_numbers = #tpu.dot_dimension_numbers<[1], [0], [0], [1], [0, 0, 1, 1], [], []>} : vector<10x32xbf16>, vector<32x16xbf16>, vector<10x16xf32> -> vector<10x16xf32>
    %c133 = arith.constant 133 : index
    %c0_86 = arith.constant 0 : index
    %211 = vector.load %arg1[%c133, %c0_86] : memref<144x128xf32, #tpu.memory_space<vmem>>, vector<1x16xf32>
    %212 = vector.broadcast %211 : vector<1x16xf32> to vector<10x16xf32>
    %213 = arith.addf %210, %212 : vector<10x16xf32>
    %214 = arith.truncf %201 : vector<10x16xf32> to vector<10x16xbf16>
    %215 = arith.truncf %207 : vector<10x16xf32> to vector<10x16xbf16>
    %cst_87 = arith.constant dense<0.000000e+00> : vector<10x10xf32>
    %216 = tpu.matmul %214, %215, %cst_87 {dimension_numbers = #tpu.dot_dimension_numbers<[1], [1], [0], [0], [0, 0, 1, 0], [], []>} : vector<10x16xbf16>, vector<10x16xbf16>, vector<10x10xf32> -> vector<10x10xf32>
    %217 = arith.addf %216, %7 : vector<10x10xf32>
    %cst_88 = arith.constant dense<0xFF800000> : vector<10xf32>
    %218 = vector.multi_reduction <maximumf>, %217, %cst_88 [1] : vector<10x10xf32> to vector<10xf32>
    %219 = vector.shape_cast %218 : vector<10xf32> to vector<10x1xf32>
    %220 = vector.broadcast %219 : vector<10x1xf32> to vector<10x10xf32>
    %221 = arith.subf %217, %220 : vector<10x10xf32>
    %222 = math.exp %221 : vector<10x10xf32>
    %cst_89 = arith.constant dense<0.000000e+00> : vector<10xf32>
    %223 = vector.multi_reduction <add>, %222, %cst_89 [1] : vector<10x10xf32> to vector<10xf32>
    %224 = vector.shape_cast %223 : vector<10xf32> to vector<10x1xf32>
    %225 = tpu.reciprocal %224 {approx = true} : vector<10x1xf32> -> vector<10x1xf32>
    %226 = vector.broadcast %225 : vector<10x1xf32> to vector<10x10xf32>
    %227 = arith.mulf %222, %226 : vector<10x10xf32>
    %228 = arith.truncf %227 : vector<10x10xf32> to vector<10x10xbf16>
    %229 = arith.truncf %213 : vector<10x16xf32> to vector<10x16xbf16>
    %cst_90 = arith.constant dense<0.000000e+00> : vector<10x16xf32>
    %230 = tpu.matmul %228, %229, %cst_90 {dimension_numbers = #tpu.dot_dimension_numbers<[1], [0], [0], [1], [0, 0, 1, 1], [], []>} : vector<10x10xbf16>, vector<10x16xbf16>, vector<10x16xf32> -> vector<10x16xf32>
    %c528 = arith.constant 528 : index
    %c0_91 = arith.constant 0 : index
    %231 = vector.load %arg2[%c528, %c0_91] : memref<640x128xbf16, #tpu.memory_space<vmem>>, vector<16x32xbf16>
    %232 = arith.truncf %230 : vector<10x16xf32> to vector<10x16xbf16>
    %cst_92 = arith.constant dense<0.000000e+00> : vector<10x32xf32>
    %233 = tpu.matmul %232, %231, %cst_92 {dimension_numbers = #tpu.dot_dimension_numbers<[1], [0], [0], [1], [0, 0, 1, 1], [], []>} : vector<10x16xbf16>, vector<16x32xbf16>, vector<10x32xf32> -> vector<10x32xf32>
    %234 = arith.addf %195, %233 : vector<10x32xf32>
    %235 = arith.addf %141, %234 : vector<10x32xf32>
    %c134 = arith.constant 134 : index
    %c0_93 = arith.constant 0 : index
    %236 = vector.load %arg1[%c134, %c0_93] : memref<144x128xf32, #tpu.memory_space<vmem>>, vector<1x32xf32>
    %237 = vector.broadcast %236 : vector<1x32xf32> to vector<10x32xf32>
    %238 = arith.addf %235, %237 : vector<10x32xf32>
    %cst_94 = arith.constant dense<0.000000e+00> : vector<10xf32>
    %239 = vector.multi_reduction <add>, %238, %cst_94 [1] : vector<10x32xf32> to vector<10xf32>
    %240 = vector.shape_cast %239 : vector<10xf32> to vector<10x1xf32>
    %cst_95 = arith.constant 3.200000e+01 : f32
    %241 = vector.broadcast %cst_95 : f32 to vector<10x1xf32>
    %242 = arith.divf %240, %241 : vector<10x1xf32>
    %243 = vector.broadcast %242 : vector<10x1xf32> to vector<10x32xf32>
    %244 = arith.subf %238, %243 : vector<10x32xf32>
    %245 = arith.mulf %244, %244 : vector<10x32xf32>
    %cst_96 = arith.constant dense<0.000000e+00> : vector<10xf32>
    %246 = vector.multi_reduction <add>, %245, %cst_96 [1] : vector<10x32xf32> to vector<10xf32>
    %247 = vector.shape_cast %246 : vector<10xf32> to vector<10x1xf32>
    %cst_97 = arith.constant 3.200000e+01 : f32
    %248 = vector.broadcast %cst_97 : f32 to vector<10x1xf32>
    %249 = arith.divf %247, %248 : vector<10x1xf32>
    %cst_98 = arith.constant 9.99999997E-7 : f32
    %250 = vector.broadcast %cst_98 : f32 to vector<10x1xf32>
    %251 = arith.addf %249, %250 : vector<10x1xf32>
    %252 = math.rsqrt %251 : vector<10x1xf32>
    %253 = vector.broadcast %252 : vector<10x1xf32> to vector<10x32xf32>
    %254 = arith.mulf %244, %253 : vector<10x32xf32>
    %c544 = arith.constant 544 : index
    %c0_99 = arith.constant 0 : index
    %255 = vector.load %arg2[%c544, %c0_99] : memref<640x128xbf16, #tpu.memory_space<vmem>>, vector<32x64xbf16>
    %256 = arith.truncf %254 : vector<10x32xf32> to vector<10x32xbf16>
    %cst_100 = arith.constant dense<0.000000e+00> : vector<10x64xf32>
    %257 = tpu.matmul %256, %255, %cst_100 {dimension_numbers = #tpu.dot_dimension_numbers<[1], [0], [0], [1], [0, 0, 1, 1], [], []>} : vector<10x32xbf16>, vector<32x64xbf16>, vector<10x64xf32> -> vector<10x64xf32>
    %c135 = arith.constant 135 : index
    %c0_101 = arith.constant 0 : index
    %258 = vector.load %arg1[%c135, %c0_101] : memref<144x128xf32, #tpu.memory_space<vmem>>, vector<1x64xf32>
    %259 = vector.broadcast %258 : vector<1x64xf32> to vector<10x64xf32>
    %260 = arith.addf %257, %259 : vector<10x64xf32>
    %cst_102 = arith.constant 5.000000e-01 : f32
    %261 = vector.broadcast %cst_102 : f32 to vector<10x64xf32>
    %262 = arith.mulf %261, %260 : vector<10x64xf32>
    %cst_103 = arith.constant 0.707106769 : f32
    %263 = vector.broadcast %cst_103 : f32 to vector<10x64xf32>
    %264 = arith.mulf %260, %263 : vector<10x64xf32>
    %265 = math.erf %264 : vector<10x64xf32>
    %cst_104 = arith.constant 1.000000e+00 : f32
    %266 = vector.broadcast %cst_104 : f32 to vector<10x64xf32>
    %267 = arith.addf %266, %265 : vector<10x64xf32>
    %268 = arith.mulf %262, %267 : vector<10x64xf32>
    %c576 = arith.constant 576 : index
    %c0_105 = arith.constant 0 : index
    %269 = vector.load %arg2[%c576, %c0_105] : memref<640x128xbf16, #tpu.memory_space<vmem>>, vector<64x32xbf16>
    %270 = arith.truncf %268 : vector<10x64xf32> to vector<10x64xbf16>
    %cst_106 = arith.constant dense<0.000000e+00> : vector<10x32xf32>
    %271 = tpu.matmul %270, %269, %cst_106 {dimension_numbers = #tpu.dot_dimension_numbers<[1], [0], [0], [1], [0, 0, 1, 1], [], []>} : vector<10x64xbf16>, vector<64x32xbf16>, vector<10x32xf32> -> vector<10x32xf32>
    %272 = arith.addf %238, %271 : vector<10x32xf32>
    %c136 = arith.constant 136 : index
    %c0_107 = arith.constant 0 : index
    %273 = vector.load %arg1[%c136, %c0_107] : memref<144x128xf32, #tpu.memory_space<vmem>>, vector<1x32xf32>
    %274 = vector.broadcast %273 : vector<1x32xf32> to vector<10x32xf32>
    %275 = arith.addf %272, %274 : vector<10x32xf32>
    %c96_108 = arith.constant 96 : index
    %c0_109 = arith.constant 0 : index
    %276 = vector.load %arg1[%c96_108, %c0_109] : memref<144x128xf32, #tpu.memory_space<vmem>>, vector<2x10xf32>
    %cst_110 = arith.constant dense<0.000000e+00> : vector<2x32xf32>
    %277 = tpu.matmul %276, %275, %cst_110 {dimension_numbers = #tpu.dot_dimension_numbers<[1], [0], [0], [1], [0, 0, 1, 1], [], []>} : vector<2x10xf32>, vector<10x32xf32>, vector<2x32xf32> -> vector<2x32xf32>
    %cst_111 = arith.constant dense<0.000000e+00> : vector<2xf32>
    %278 = vector.multi_reduction <add>, %277, %cst_111 [1] : vector<2x32xf32> to vector<2xf32>
    %279 = vector.shape_cast %278 : vector<2xf32> to vector<2x1xf32>
    %cst_112 = arith.constant 3.200000e+01 : f32
    %280 = vector.broadcast %cst_112 : f32 to vector<2x1xf32>
    %281 = arith.divf %279, %280 : vector<2x1xf32>
    %282 = vector.broadcast %281 : vector<2x1xf32> to vector<2x32xf32>
    %283 = arith.subf %277, %282 : vector<2x32xf32>
    %284 = arith.mulf %283, %283 : vector<2x32xf32>
    %cst_113 = arith.constant dense<0.000000e+00> : vector<2xf32>
    %285 = vector.multi_reduction <add>, %284, %cst_113 [1] : vector<2x32xf32> to vector<2xf32>
    %286 = vector.shape_cast %285 : vector<2xf32> to vector<2x1xf32>
    %cst_114 = arith.constant 3.200000e+01 : f32
    %287 = vector.broadcast %cst_114 : f32 to vector<2x1xf32>
    %288 = arith.divf %286, %287 : vector<2x1xf32>
    %cst_115 = arith.constant 9.99999997E-7 : f32
    %289 = vector.broadcast %cst_115 : f32 to vector<2x1xf32>
    %290 = arith.addf %288, %289 : vector<2x1xf32>
    %291 = math.rsqrt %290 : vector<2x1xf32>
    %292 = vector.broadcast %291 : vector<2x1xf32> to vector<2x32xf32>
    %293 = arith.mulf %283, %292 : vector<2x32xf32>
    %c104 = arith.constant 104 : index
    %c0_116 = arith.constant 0 : index
    %294 = vector.load %arg1[%c104, %c0_116] : memref<144x128xf32, #tpu.memory_space<vmem>>, vector<1x32xf32>
    %c105 = arith.constant 105 : index
    %c0_117 = arith.constant 0 : index
    %295 = vector.load %arg1[%c105, %c0_117] : memref<144x128xf32, #tpu.memory_space<vmem>>, vector<1x1xf32>
    %296 = vector.broadcast %294 : vector<1x32xf32> to vector<2x32xf32>
    %297 = arith.mulf %293, %296 : vector<2x32xf32>
    %cst_118 = arith.constant dense<0.000000e+00> : vector<2xf32>
    %298 = vector.multi_reduction <add>, %297, %cst_118 [1] : vector<2x32xf32> to vector<2xf32>
    %299 = vector.shape_cast %298 : vector<2xf32> to vector<2x1xf32>
    %300 = vector.broadcast %295 : vector<1x1xf32> to vector<2x1xf32>
    %301 = arith.addf %299, %300 : vector<2x1xf32>
    %302 = arith.negf %301 : vector<2x1xf32>
    %303 = math.exp %302 : vector<2x1xf32>
    %cst_119 = arith.constant 1.000000e+00 : f32
    %304 = vector.broadcast %cst_119 : f32 to vector<2x1xf32>
    %305 = arith.addf %304, %303 : vector<2x1xf32>
    %306 = arith.divf %304, %305 : vector<2x1xf32>
    %307 = vector.shape_cast %306 : vector<2x1xf32> to vector<2x1xf32>
    %308 = vector.broadcast %307 : vector<2x1xf32> to vector<2x128xf32>
    %c0_120 = arith.constant 0 : index
    %c0_121 = arith.constant 0 : index
    %309 = vector.load %arg3[%c0_120, %c0_121] : memref<2x128xf32, #tpu.memory_space<vmem>>, vector<2x128xf32>
    tpu.vector_store %arg3[%c0_120, %c0_121], %308 {strides = array<i32>} : memref<2x128xf32, #tpu.memory_space<vmem>>, vector<2x128xf32>,
    return
  }
}

</mosaic_0001>

<bundles_post_ra>
// kernel: squeeze.1
= control target key start
LH: loop header
LB: loop body
LE: loop exit
PB: predicated region body
PF: predicated region fallthrough
CT: control target
= control target key end

     0   :  { %2 = vsyncpa [#allocation1], 0  ;;  %s351_s6 = smov [#allocation0]   ;;  %s487_s0 = inlined_call_operand.hbm [shape: f32[2,1,16,16], index: 0, kind: input, shape index: {}]   ;;  %s488_s1 = inlined_call_operand.vmem [shape: f32[2,2,8,2,8], index: 1, kind: output, shape index: {}]  }
   0x1   :  { %s7_s7 = sshll.u32 %s351_s6, 4  ;;  %s327_s10 = scalar_lea.hbm %s487_s0, 512  ;;  %s8_s7 = int_to_ptr.vmem [resolvable:$true] %s7_s7 }
   0x2   :  { %p328_p0 = scmp.ne.s32.totalorder %s487_s0, %s327_s10  ;;  %p331_p1 = scmp.lt.u32.totalorder %s327_s10, %s487_s0 }
   0x4   :  { %p333_p2 = pnand %p331_p1, %p328_p0 }
   0x6   :  { %336 = shalt.err (!%p333_p2)
}
   0x7   :  { %s337_s15 = scalar_lea.vmem %s8_s7, 512  ;;  %p342_p4 = scmp.lt.s32.totalorder %s8_s7, %s8_s7 }
   0x8   :  { %p338_p3 = scmp.ne.s32.totalorder %s8_s7, %s337_s15  ;;  %p343_p5 = scmp.lt.s32.totalorder %s337_s15, %s337_s15 }
   0xa   :  { %p344_p6 = por %p343_p5, %p342_p4 }
   0xc   :  { %p345_p7 = pnand %p344_p6, %p338_p3 }
   0xe   :  { %348 = shalt.err (!%p345_p7)
}
   0xf   :  { %10 = dma.hbm_to_vmem [thread:$0]  %s487_s0, 512, %s8_s7, [#allocation1]  }
  0x10   :  { %349 = dma.done.wait [#allocation1], 512  }
  0x11   :  { %350 = vsyncadd [#allocation1], 4294966784  ;;  %vm13_vm0 = vcmask 64512   ;;  %v55_v0 = vld [vmem:[#allocation0 + $0x10] sm:$0xff]   ;;  %v37_v1 = vld [vmem:[#allocation0] sm:$0xff]   ;;  %s352_s0 = smov 120  }
  0x12   :  { %v64_v2 = vld [vmem:[#allocation0 + $0x18] sm:$0xff]   ;;  %56 = vrot.lane.b32.xlu1 %v55_v0, %s352_s0  ;;  %38 = vrot.lane.b32.xlu0 %v37_v1, %s352_s0  ;;  %v46_v3 = vld [vmem:[#allocation0 + $0x8] sm:$0xff]   ;;  %27 = vst.msk [vmem:[#allocation2 + $0x80] ss:$8 sm:$0xf] %vm13_vm0, %v55_v0  }
  0x13   :  { %29 = vst.msk [vmem:[#allocation2 + $0x80] ss:$8 sm:$0xf0] %vm13_vm0, %v55_v0   ;;  %14 = vst.msk [vmem:[#allocation2] ss:$8 sm:$0xf] %vm13_vm0, %v37_v1  }
  0x14   :  { %15 = vst.msk [vmem:[#allocation2] ss:$8 sm:$0xf0] %vm13_vm0, %v37_v1   ;;  %34 = vst.msk [vmem:[#allocation2 + $0xc0] ss:$8 sm:$0xf] %vm13_vm0, %v64_v2  }
  0x15   :  { %36 = vst.msk [vmem:[#allocation2 + $0xc0] ss:$8 sm:$0xf0] %vm13_vm0, %v64_v2   ;;  %20 = vst.msk [vmem:[#allocation2 + $0x40] ss:$8 sm:$0xf] %vm13_vm0, %v46_v3  }
  0x16   :  { %22 = vst.msk [vmem:[#allocation2 + $0x40] ss:$8 sm:$0xf0] %vm13_vm0, %v46_v3   ;;  %65 = vrot.lane.b32.xlu1 %v64_v2, %s352_s0  ;;  %47 = vrot.lane.b32.xlu0 %v46_v3, %s352_s0 }
  0x84   :  { %v57_v4 = vpop.permute.xlu1 %56   ;;  %v39_v5 = vpop.permute.xlu0 %38  }
  0x85   :  { %60 = vst.msk [vmem:[#allocation2 + $0x81] ss:$8 sm:$0xf] %vm13_vm0, %v57_v4   ;;  %62 = vst.msk [vmem:[#allocation2 + $0x81] ss:$8 sm:$0xf0] %vm13_vm0, %v57_v4  }
  0x86   :  { %42 = vst.msk [vmem:[#allocation2 + $0x1] ss:$8 sm:$0xf] %vm13_vm0, %v39_v5   ;;  %44 = vst.msk [vmem:[#allocation2 + $0x1] ss:$8 sm:$0xf0] %vm13_vm0, %v39_v5  }
  0x88   :  { %v66_v6 = vpop.permute.xlu1 %65   ;;  %v48_v7 = vpop.permute.xlu0 %47  }
  0x89   :  { %69 = vst.msk [vmem:[#allocation2 + $0xc1] ss:$8 sm:$0xf] %vm13_vm0, %v66_v6   ;;  %71 = vst.msk [vmem:[#allocation2 + $0xc1] ss:$8 sm:$0xf0] %vm13_vm0, %v66_v6  }
  0x8a   :  { %51 = vst.msk [vmem:[#allocation2 + $0x41] ss:$8 sm:$0xf] %vm13_vm0, %v48_v7   ;;  %53 = vst.msk [vmem:[#allocation2 + $0x41] ss:$8 sm:$0xf0] %vm13_vm0, %v48_v7  }
  0x8c   :  { %v168_v8 = vld [vmem:[#allocation2 + $0x80] sm:$0x3]  ;;  %v174_v9 = vld [vmem:[#allocation2 + $0x88] sm:$0x3]  ;;  %v180_v10 = vld [vmem:[#allocation2 + $0x90] sm:$0x3] }
  0x8d   :  { %309 = vst [vmem:[%s488_s1 + $0x20] sm:$0x3] %v168_v8  ;;  %310 = vst [vmem:[%s488_s1 + $0x22] sm:$0x3] %v174_v9  ;;  %v186_v11 = vld [vmem:[#allocation2 + $0x98] sm:$0x3] }
  0x8e   :  { %311 = vst [vmem:[%s488_s1 + $0x24] sm:$0x3] %v180_v10  ;;  %v192_v12 = vld [vmem:[#allocation2 + $0xa0] sm:$0x3]  ;;  %v198_v13 = vld [vmem:[#allocation2 + $0xa8] sm:$0x3] }
  0x8f   :  { %312 = vst [vmem:[%s488_s1 + $0x26] sm:$0x3] %v186_v11  ;;  %313 = vst [vmem:[%s488_s1 + $0x28] sm:$0x3] %v192_v12  ;;  %v204_v14 = vld [vmem:[#allocation2 + $0xb0] sm:$0x3] }
  0x90   :  { %314 = vst [vmem:[%s488_s1 + $0x2a] sm:$0x3] %v198_v13  ;;  %v210_v15 = vld [vmem:[#allocation2 + $0xb8] sm:$0x3]  ;;  %v75_v16 = vld [vmem:[#allocation2] sm:$0x3] }
  0x91   :  { %315 = vst [vmem:[%s488_s1 + $0x2c] sm:$0x3] %v204_v14  ;;  %316 = vst [vmem:[%s488_s1 + $0x2e] sm:$0x3] %v210_v15  ;;  %v79_v17 = vld [vmem:[#allocation2 + $0x8] sm:$0x3] }
  0x92   :  { %77 = vst [vmem:[%s488_s1] sm:$0x3] %v75_v16  ;;  %v84_v18 = vld [vmem:[#allocation2 + $0x10] sm:$0x3]  ;;  %v90_v19 = vld [vmem:[#allocation2 + $0x18] sm:$0x3] }
  0x93   :  { %294 = vst [vmem:[%s488_s1 + $0x2] sm:$0x3] %v79_v17  ;;  %295 = vst [vmem:[%s488_s1 + $0x4] sm:$0x3] %v84_v18  ;;  %v96_v20 = vld [vmem:[#allocation2 + $0x20] sm:$0x3] }
  0x94   :  { %296 = vst [vmem:[%s488_s1 + $0x6] sm:$0x3] %v90_v19  ;;  %v102_v21 = vld [vmem:[#allocation2 + $0x28] sm:$0x3]  ;;  %v108_v22 = vld [vmem:[#allocation2 + $0x30] sm:$0x3] }
  0x95   :  { %297 = vst [vmem:[%s488_s1 + $0x8] sm:$0x3] %v96_v20  ;;  %298 = vst [vmem:[%s488_s1 + $0xa] sm:$0x3] %v102_v21  ;;  %v114_v23 = vld [vmem:[#allocation2 + $0x38] sm:$0x3] }
  0x96   :  { %299 = vst [vmem:[%s488_s1 + $0xc] sm:$0x3] %v108_v22  ;;  %v216_v24 = vld [vmem:[#allocation2 + $0xc0] sm:$0x3]  ;;  %v222_v25 = vld [vmem:[#allocation2 + $0xc8] sm:$0x3] }
  0x97   :  { %300 = vst [vmem:[%s488_s1 + $0xe] sm:$0x3] %v114_v23  ;;  %317 = vst [vmem:[%s488_s1 + $0x30] sm:$0x3] %v216_v24  ;;  %v228_v26 = vld [vmem:[#allocation2 + $0xd0] sm:$0x3] }
  0x98   :  { %318 = vst [vmem:[%s488_s1 + $0x32] sm:$0x3] %v222_v25  ;;  %v234_v27 = vld [vmem:[#allocation2 + $0xd8] sm:$0x3]  ;;  %v240_v28 = vld [vmem:[#allocation2 + $0xe0] sm:$0x3] }
  0x99   :  { %319 = vst [vmem:[%s488_s1 + $0x34] sm:$0x3] %v228_v26  ;;  %320 = vst [vmem:[%s488_s1 + $0x36] sm:$0x3] %v234_v27  ;;  %v246_v29 = vld [vmem:[#allocation2 + $0xe8] sm:$0x3] }
  0x9a   :  { %321 = vst [vmem:[%s488_s1 + $0x38] sm:$0x3] %v240_v28  ;;  %v252_v30 = vld [vmem:[#allocation2 + $0xf0] sm:$0x3]  ;;  %v258_v31 = vld [vmem:[#allocation2 + $0xf8] sm:$0x3] }
  0x9b   :  { %322 = vst [vmem:[%s488_s1 + $0x3a] sm:$0x3] %v246_v29  ;;  %323 = vst [vmem:[%s488_s1 + $0x3c] sm:$0x3] %v252_v30  ;;  %v120_v32 = vld [vmem:[#allocation2 + $0x40] sm:$0x3] }
  0x9c   :  { %324 = vst [vmem:[%s488_s1 + $0x3e] sm:$0x3] %v258_v31  ;;  %v126_v33 = vld [vmem:[#allocation2 + $0x48] sm:$0x3]  ;;  %v132_v34 = vld [vmem:[#allocation2 + $0x50] sm:$0x3] }
  0x9d   :  { %301 = vst [vmem:[%s488_s1 + $0x10] sm:$0x3] %v120_v32  ;;  %302 = vst [vmem:[%s488_s1 + $0x12] sm:$0x3] %v126_v33  ;;  %v138_v35 = vld [vmem:[#allocation2 + $0x58] sm:$0x3] }
  0x9e   :  { %303 = vst [vmem:[%s488_s1 + $0x14] sm:$0x3] %v132_v34  ;;  %v144_v36 = vld [vmem:[#allocation2 + $0x60] sm:$0x3]  ;;  %v150_v37 = vld [vmem:[#allocation2 + $0x68] sm:$0x3] }
  0x9f   :  { %304 = vst [vmem:[%s488_s1 + $0x16] sm:$0x3] %v138_v35  ;;  %305 = vst [vmem:[%s488_s1 + $0x18] sm:$0x3] %v144_v36  ;;  %v156_v38 = vld [vmem:[#allocation2 + $0x70] sm:$0x3] }
  0xa0   :  { %306 = vst [vmem:[%s488_s1 + $0x1a] sm:$0x3] %v150_v37  ;;  %v162_v39 = vld [vmem:[#allocation2 + $0x78] sm:$0x3]  ;;  %307 = vst [vmem:[%s488_s1 + $0x1c] sm:$0x3] %v156_v38 }
  0xa1   :  { %308 = vst [vmem:[%s488_s1 + $0x1e] sm:$0x3] %v162_v39 }
  0xa2   :  { %263 = vsyncpa [#allocation1], 1 }

// kernel: vit_forward.1
= control target key start
LH: loop header
LB: loop body
LE: loop exit
PB: predicated region body
PF: predicated region fallthrough
CT: control target
= control target key end

     0   :  { %8 = vsyncpa [#allocation3], 0  ;;  %s2656_s12 = smov [#allocation2]   ;;  %s3090_s0 = inlined_call_operand.vmem [shape: f32[10,64], index: 0, kind: input, shape index: {}]   ;;  %s3091_s1 = inlined_call_operand.hbm [shape: f32[144,128], index: 1, kind: input, shape index: {}]   ;;  %s3092_s2 = inlined_call_operand.vmem [shape: bf16[640,128], index: 2, kind: input, shape index: {}]   ;;  %s3093_s3 = inlined_call_operand.vmem [shape: f32[2,128], index: 3, kind: output, shape index: {}]  }
   0x1   :  { %s16_s13 = sshll.u32 %s2656_s12, 4  ;;  %s2632_s16 = scalar_lea.hbm %s3091_s1, 2304  ;;  %s17_s13 = int_to_ptr.vmem [resolvable:$true] %s16_s13 }
   0x2   :  { %p2633_p0 = scmp.ne.s32.totalorder %s3091_s1, %s2632_s16  ;;  %p2636_p1 = scmp.lt.u32.totalorder %s2632_s16, %s3091_s1 }
   0x4   :  { %p2638_p2 = pnand %p2636_p1, %p2633_p0 }
   0x6   :  { %2641 = shalt.err (!%p2638_p2)
}
   0x7   :  { %s2642_s21 = scalar_lea.vmem %s17_s13, 2304  ;;  %p2647_p4 = scmp.lt.s32.totalorder %s17_s13, %s17_s13 }
   0x8   :  { %p2643_p3 = scmp.ne.s32.totalorder %s17_s13, %s2642_s21  ;;  %p2648_p5 = scmp.lt.s32.totalorder %s2642_s21, %s2642_s21 }
   0xa   :  { %p2649_p6 = por %p2648_p5, %p2647_p4 }
   0xc   :  { %p2650_p7 = pnand %p2649_p6, %p2643_p3 }
   0xe   :  { %2653 = shalt.err (!%p2650_p7)
}
   0xf   :  { %s2657_s22 = smov 128   ;;  %s2658_s23 = smov 8  }
  0x10   :  { %22 = dma.hbm_to_vmem [thread:$0]  %s3091_s1, 2304, %s17_s13, [#allocation3], %s2657_s22, %s2657_s22, %s2658_s23  }
  0x11   :  { %2654 = dma.done.wait [#allocation3], 2304  }
  0x12   :  { %2655 = vsyncadd [#allocation3], 4294964992  ;;  %v2659_v0 = vmov 0.0   ;;  %vm2660_vm0 = vmmov 0   ;;  %v29_v1 = vld [vmem:[#allocation2] sm:$0xff]  ;;  %v30_v2 = vld [vmem:[#allocation2 + $0x8] sm:$0xff] }
  0x13   :  { %2289 = vmatprep.subr.bf16.mxu0 %v2659_v0  ;;  %2297 = vmatprep.mubr.msk.bf16.mxu0 %vm2660_vm0, %v2659_v0  ;;  %v31_v3 = vld [vmem:[#allocation2 + $0x10] sm:$0xff]  ;;  %v40_v4 = vpack.c.bf16 %v30_v2, %v29_v1  ;;  %v32_v5 = vld [vmem:[#allocation2 + $0x18] sm:$0xff]  ;;  %v33_v7 = vld [vmem:[#allocation2 + $0x20] sm:$0xff]  ;;  %vm46_vm1 = vcmask 523264   ;;  %vm93_vm2 = vcmask 261120   ;;  %vm97_vm3 = vcmask 254976  }
  0x14   :  { %2301 = vmatprep.subr.bf16.mxu1 %v2659_v0  ;;  %2305 = vmatprep.mubr.msk.bf16.mxu1 %vm2660_vm0, %v2659_v0  ;;  %v41_v6 = vpack.c.bf16 %v32_v5, %v31_v3  ;;  %v34_v8 = vld [vmem:[#allocation2 + $0x28] sm:$0xff]  ;;  %v35_v9 = vld [vmem:[#allocation2 + $0x30] sm:$0xff]  ;;  %v36_v10 = vld [vmem:[#allocation2 + $0x38] sm:$0xff]  ;;  %vm314_vm4 = vcmask 130048   ;;  %vm391_vm5 = vcmask 1044480   ;;  %vm362_vm6 = vcmask 80896  }
  0x15   :  { %2290 = vmatpush3.bf16.msra.mxu0 %v40_v4  ;;  %v42_v11 = vpack.c.bf16 %v34_v8, %v33_v7  ;;  %v37_v12 = vld [vmem:[%s3090_s0] sm:$0xff]  ;;  %v38_v13 = vld [vmem:[%s3090_s0 + $0x8] sm:$0x3]  ;;  %v43_v14 = vpack.c.bf16 %v36_v10, %v35_v9  ;;  %v2532_v48 = vld [vmem:[%s3092_s2 + $0x10] sm:$0xff]   ;;  %vm366_vm7 = vcmask 74752   ;;  %vm1994_vm8 = vcmask 1041408  }
  0x16   :  { %2291 = vmatprep.subr.bf16.mxu0 %v2659_v0  ;;  %v39_v15 = vpack.c.bf16 %v38_v13, %v37_v12  ;;  %v44_v16 = vld [vmem:[#allocation2 + $0x40] sm:$0xff]  ;;  %v45_v18 = vld [vmem:[#allocation2 + $0x48] sm:$0x3]  ;;  %v2533_v50 = vld [vmem:[%s3092_s2 + $0x18] sm:$0xff]   ;;  %vm2662_vm9 = vmmov 1  }
  0x17   :  { %v2530_v36 = vld [vmem:[%s3092_s2] sm:$0xff]   ;;  %v2531_v37 = vld [vmem:[%s3092_s2 + $0x8] sm:$0xff]   ;;  %v2114_v53 = vld [vmem:[#allocation2 + $0x70] ss:$0 sm:$0xff] }
  0x18   :  { %2302 = vmatpush3.bf16.msra.mxu1 %v2530_v36  ;;  %v2534_v51 = vld [vmem:[%s3092_s2 + $0x20] sm:$0xff]   ;;  %v2535_v52 = vld [vmem:[%s3092_s2 + $0x28] sm:$0xff]   ;;  %v2118_v61 = vld [vmem:[#allocation2 + $0x71] ss:$0 sm:$0xff] }
  0x19   :  { %2292 = vmatpush3.bf16.msra.mxu0 %v41_v6  ;;  %2303 = vmatprep.subr.bf16.mxu1 %v2659_v0  ;;  %v2122_v7 = vld [vmem:[#allocation2 + $0x72] ss:$0 sm:$0xff]  ;;  %vm2518_vm10 = vmpackc.low %vm1994_vm8, %vm2662_vm9 }
  0x1a   :  { %2293 = vmatprep.subr.bf16.mxu0 %v2659_v0 }
  0x1c   :  { %2304 = vmatpush3.bf16.msra.mxu1 %v2531_v37 }
  0x1d   :  { %2294 = vmatpush3.bf16.msra.mxu0 %v42_v11  ;;  %2309 = vmatprep.subr.bf16.mxu1 %v2659_v0 }
  0x1e   :  { %2295 = vmatprep.subr.bf16.mxu0 %v2659_v0 }
  0x21   :  { %2296 = vmatpush3.bf16.msra.mxu0 %v43_v14  ;;  %v2536_v14 = vld [vmem:[%s3092_s2 + $0x30] sm:$0xff]  }
  0x22   :  { %2331 = vmatprep.subr.bf16.mxu0 %v2659_v0 }
  0x24   :  { %2298 = vmatmul.mubr.msk.bf16.vlgmr.msra.gmra.mrb[0].mxu0 %vm46_vm1, %v39_v15 }
  0x25   :  { %2333 = vmatprep.mubr.msk.bf16.mxu0 %vm2660_vm0, %v2659_v0 }
  0xf7   :  { %v84_v17 = vpop.f32.mrb[0].mxu0 }
  0xf8   :  { %v2715_v19 = vadd.f32 %v84_v17, %v44_v16  ;;  %v2299_v20 = vpop.f32.mrb[1].mxu0  ;;  %v2537_v17 = vld [vmem:[%s3092_s2 + $0x38] sm:$0xff]  }
  0xf9   :  { %v87_v21 = vpop.f32.mrb[2].mxu0  ;;  %v2539_v20 = vld [vmem:[%s3092_s2 + $0x58] sm:$0xff]  }
  0xfa   :  { %v2717_v22 = vadd.f32 %v87_v21, %v45_v18  ;;  %v2300_v23 = vpop.f32.mrb[3].mxu0  ;;  %v94_v24 = vsel %vm93_vm2, %v2715_v19, 0.0  ;;  %v2538_v18 = vld [vmem:[%s3092_s2 + $0x50] sm:$0xff]  }
  0xfb   :  { %95 = vadd.xlane.f32.xlu0 %v94_v24  ;;  %v2796_v21 = vld [vmem:[#allocation2 + $0x50] sm:$0xff]  ;;  %v2798_v24 = vld [vmem:[#allocation2 + $0x58] sm:$0x3] }
  0xfc   :  { %v98_v25 = vsel %vm97_vm3, %v2717_v22, 0.0 }
  0xff   :  { %99 = vadd.xlane.f32.xlu0 %v98_v25 }
 0x188   :  { %v96_v26 = vpop.xlane.xlu0 %95 }
 0x189   :  { %v102_v27 = vmul.f32 0.03125, %v96_v26 }
 0x18b   :  { %v104_v28 = vsub.f32 %v2715_v19, %v102_v27 }
 0x18c   :  { %v100_v29 = vpop.xlane.xlu0 %99 }
 0x18d   :  { %v103_v30 = vmul.f32 0.03125, %v100_v29  ;;  %v106_v31 = vmul.f32 %v104_v28, %v104_v28 }
 0x18f   :  { %v105_v32 = vsub.f32 %v2717_v22, %v103_v30  ;;  %v108_v33 = vsel %vm93_vm2, %v106_v31, 0.0 }
 0x190   :  { %109 = vadd.xlane.f32.xlu1 %v108_v33 }
 0x191   :  { %v107_v34 = vmul.f32 %v105_v32, %v105_v32 }
 0x193   :  { %v111_v35 = vsel %vm97_vm3, %v107_v34, 0.0 }
 0x194   :  { %112 = vadd.xlane.f32.xlu1 %v111_v35 }
 0x21d   :  { %v110_v38 = vpop.xlane.xlu1 %109 }
 0x21e   :  { %v114_v39 = vmul.f32 0.03125, %v110_v38 }
 0x220   :  { %v116_v40 = vadd.f32 1e-06, %v114_v39 }
 0x221   :  { %v113_v41 = vpop.xlane.xlu1 %112 }
 0x222   :  { %v115_v42 = vmul.f32 0.03125, %v113_v41  ;;  %2570 = vrsqrt.f32 %v116_v40  ;;  %v2136_v40 = vld [vmem:[#allocation2 + $0x75] ss:$0 sm:$0xff] }
 0x224   :  { %v117_v43 = vadd.f32 1e-06, %v115_v42 }
 0x226   :  { %2572 = vrsqrt.f32 %v117_v43 }
 0x22c   :  { %v2571_v44 = vpop.eup %2570 }
 0x22d   :  { %v120_v46 = vmul.f32 %v2571_v44, %v104_v28 }
 0x230   :  { %v2573_v45 = vpop.eup %2572 }
 0x231   :  { %v121_v47 = vmul.f32 %v2573_v45, %v105_v32  ;;  %v2128_v32 = vld [vmem:[#allocation2 + $0x73] ss:$0 sm:$0xff] }
 0x233   :  { %v2738_v49 = vpack.c.bf16 %v121_v47, %v120_v46 }
 0x235   :  { %2306 = vmatmul.mubr.msk.bf16.vlgmr.msra.gmra.mrb[0].mxu1 %vm93_vm2, %v2738_v49 }
 0x236   :  { %2310 = vmatpush3.bf16.msra.mxu1 %v2532_v48  ;;  %2313 = vmatprep.mubr.msk.bf16.mxu1 %vm2660_vm0, %v2659_v0 }
 0x237   :  { %2311 = vmatprep.subr.bf16.mxu1 %v2659_v0 }
 0x23a   :  { %2312 = vmatpush3.bf16.msra.mxu1 %v2533_v50 }
 0x23b   :  { %2317 = vmatprep.subr.bf16.mxu1 %v2659_v0 }
 0x23d   :  { %2314 = vmatmul.mubr.msk.bf16.vlgmr.msra.gmra.mrb[4].mxu1 %vm93_vm2, %v2738_v49 }
 0x23e   :  { %2318 = vmatpush3.bf16.msra.mxu1 %v2534_v51  ;;  %2321 = vmatprep.mubr.msk.bf16.mxu1 %vm2660_vm0, %v2659_v0 }
 0x23f   :  { %2319 = vmatprep.subr.bf16.mxu1 %v2659_v0 }
 0x242   :  { %2320 = vmatpush3.bf16.msra.mxu1 %v2535_v52 }
 0x243   :  { %2325 = vmatprep.subr.bf16.mxu1 %v2659_v0 }
 0x245   :  { %2322 = vmatmul.mubr.msk.bf16.vlgmr.msra.gmra.mrb[8].mxu1 %vm93_vm2, %v2738_v49 }
 0x246   :  { %2327 = vmatprep.mubr.msk.bf16.mxu1 %vm2660_vm0, %v2659_v0 }
 0x308   :  { %v181_v54 = vpop.f32.mrb[0].mxu1 }
 0x309   :  { %v2307_v55 = vpop.f32.mrb[1].mxu1  ;;  %v182_v57 = vadd.f32 %v2114_v53, %v181_v54 }
 0x30a   :  { %v184_v56 = vpop.f32.mrb[2].mxu1 }
 0x30b   :  { %v185_v58 = vadd.f32 %v2114_v53, %v184_v56  ;;  %v2308_v59 = vpop.f32.mrb[3].mxu1 }
 0x30d   :  { %v312_v60 = vpack.c.bf16 %v185_v58, %v182_v57 }
 0x310   :  { %v243_v62 = vpop.f32.mrb[4].mxu1 }
 0x311   :  { %v2315_v63 = vpop.f32.mrb[5].mxu1  ;;  %v244_v2 = vadd.f32 %v2118_v61, %v243_v62 }
 0x312   :  { %v246_v1 = vpop.f32.mrb[6].mxu1 }
 0x313   :  { %v247_v3 = vadd.f32 %v2118_v61, %v246_v1  ;;  %v2316_v4 = vpop.f32.mrb[7].mxu1 }
 0x315   :  { %v313_v5 = vpack.c.bf16 %v247_v3, %v244_v2  ;;  %v2540_v3 = vld [vmem:[%s3092_s2 + $0x40] sm:$0xff]  }
 0x317   :  { %v319_v6 = vsel %vm314_vm4, %v313_v5, 0  ;;  %v2541_v5 = vld [vmem:[%s3092_s2 + $0x48] sm:$0xff]  }
 0x318   :  { %v305_v8 = vpop.f32.mrb[8].mxu1  ;;  %2326 = vmatpush3.bf16.xpose.msra.mxu1 %v319_v6 }
 0x319   :  { %v2323_v9 = vpop.f32.mrb[9].mxu1  ;;  %2337 = vmatprep.subr.bf16.mxu1 %v2659_v0  ;;  %v306_v11 = vadd.f32 %v2122_v7, %v305_v8 }
 0x31a   :  { %v308_v10 = vpop.f32.mrb[10].mxu1 }
 0x31b   :  { %v309_v12 = vadd.f32 %v2122_v7, %v308_v10  ;;  %v2324_v13 = vpop.f32.mrb[11].mxu1 }
 0x31d   :  { %v387_v15 = vpack.c.bf16 %v309_v12, %v306_v11  ;;  %v2132_v11 = vld [vmem:[#allocation2 + $0x74] ss:$0 sm:$0xff] }
 0x31f   :  { %2328 = vmatmul.mubr.msk.bf16.vlgmr.msra.gmra.mrb[12].mxu1 %vm314_vm4, %v312_v60  ;;  %v393_v16 = vsel %vm391_vm5, %v387_v15, 0 }
 0x320   :  { %2332 = vmatpush3.bf16.msra.mxu0 %v393_v16  ;;  %2338 = vmatpush3.bf16.msra.mxu1 %v2536_v14 }
 0x321   :  { %2339 = vmatprep.subr.bf16.mxu1 %v2659_v0  ;;  %2341 = vmatprep.mubr.msk.bf16.mxu1 %vm2660_vm0, %v2659_v0 }
 0x322   :  { %2345 = vmatprep.subr.bf16.mxu0 %v2659_v0 }
 0x324   :  { %2340 = vmatpush3.bf16.msra.mxu1 %v2537_v17 }
 0x325   :  { %2353 = vmatprep.subr.bf16.mxu1 %v2659_v0 }
 0x327   :  { %2342 = vmatmul.mubr.msk.bf16.vlgmr.msra.gmra.mrb[16].mxu1 %vm93_vm2, %v2738_v49 }
 0x328   :  { %2354 = vmatpush3.bf16.msra.mxu1 %v2538_v18  ;;  %2357 = vmatprep.mubr.msk.bf16.mxu1 %vm2660_vm0, %v2659_v0 }
 0x329   :  { %2355 = vmatprep.subr.bf16.mxu1 %v2659_v0 }
 0x32c   :  { %2356 = vmatpush3.bf16.msra.mxu1 %v2539_v20 }
 0x32d   :  { %2367 = vmatprep.subr.bf16.mxu1 %v2659_v0 }
 0x32f   :  { %2358 = vmatmul.mubr.msk.bf16.vlgmr.msra.gmra.mrb[20].mxu1 %vm93_vm2, %v2738_v49 }
 0x330   :  { %2369 = vmatprep.mubr.msk.bf16.mxu1 %vm2660_vm0, %v2659_v0 }
 0x3f2   :  { %v355_v23 = vpop.f32.mrb[12].mxu1 }
 0x3f3   :  { %v356_v25 = vadd.f32 %v355_v23, %v2796_v21  ;;  %v2329_v26 = vpop.f32.mrb[13].mxu1 }
 0x3f4   :  { %v358_v27 = vpop.f32.mrb[14].mxu1 }
 0x3f5   :  { %v359_v28 = vadd.f32 %v358_v27, %v2798_v24  ;;  %v2330_v29 = vpop.f32.mrb[15].mxu1  ;;  %v363_v30 = vsel %vm362_vm6, %v356_v25, -inf }
 0x3f6   :  { %364 = vmax.xlane.f32.xlu0 %v363_v30 }
 0x3f7   :  { %v367_v31 = vsel %vm366_vm7, %v359_v28, -inf }
 0x3f8   :  { %368 = vmax.xlane.f32.xlu1 %v367_v31 }
 0x3fa   :  { %v494_v33 = vpop.f32.mrb[16].mxu1 }
 0x3fb   :  { %v2343_v34 = vpop.f32.mrb[17].mxu1  ;;  %v2804_v36 = vadd.f32 %v2128_v32, %v494_v33 }
 0x3fc   :  { %v497_v35 = vpop.f32.mrb[18].mxu1 }
 0x3fd   :  { %v2806_v37 = vadd.f32 %v2128_v32, %v497_v35  ;;  %v2344_v38 = vpop.f32.mrb[19].mxu1 }
 0x3ff   :  { %v625_v39 = vpack.c.bf16 %v2806_v37, %v2804_v36 }
 0x402   :  { %v618_v41 = vpop.f32.mrb[20].mxu1 }
 0x403   :  { %v2359_v42 = vpop.f32.mrb[21].mxu1  ;;  %v619_v44 = vadd.f32 %v2136_v40, %v618_v41 }
 0x404   :  { %v621_v43 = vpop.f32.mrb[22].mxu1 }
 0x405   :  { %v622_v45 = vadd.f32 %v2136_v40, %v621_v43  ;;  %v2360_v46 = vpop.f32.mrb[23].mxu1 }
 0x407   :  { %v697_v47 = vpack.c.bf16 %v622_v45, %v619_v44 }
 0x409   :  { %v702_v48 = vsel %vm391_vm5, %v697_v47, 0  ;;  %v2542_v47 = vld [vmem:[%s3092_s2 + $0x60] sm:$0xff]  }
 0x40a   :  { %2368 = vmatpush3.bf16.msra.mxu1 %v702_v48 }
 0x40b   :  { %2379 = vmatprep.subr.bf16.mxu1 %v2659_v0 }
 0x483   :  { %v365_v50 = vpop.xlane.xlu0 %364 }
 0x484   :  { %v370_v51 = vsub.f32 %v356_v25, %v365_v50  ;;  %v2543_v50 = vld [vmem:[%s3092_s2 + $0x68] sm:$0xff]  }
 0x485   :  { %v369_v52 = vpop.xlane.xlu1 %368 }
 0x486   :  { %v372_v53 = vmul.f32 1.442695, %v370_v51  ;;  %v371_v54 = vsub.f32 %v359_v28, %v369_v52 }
 0x488   :  { %2574 = vpow2.f32 %v372_v53  ;;  %v374_v55 = vmul.f32 1.442695, %v371_v54 }
 0x48a   :  { %2576 = vpow2.f32 %v374_v55 }
 0x492   :  { %v2575_v56 = vpop.eup %2574 }
 0x493   :  { %v376_v57 = vsel %vm362_vm6, %v2575_v56, 0.0 }
 0x494   :  { %v2577_v58 = vpop.eup %2576  ;;  %377 = vadd.xlane.f32.xlu0 %v376_v57 }
 0x495   :  { %v379_v59 = vsel %vm366_vm7, %v2577_v58, 0.0 }
 0x496   :  { %380 = vadd.xlane.f32.xlu1 %v379_v59 }
 0x521   :  { %v378_v60 = vpop.xlane.xlu0 %377 }
 0x522   :  { %2578 = vrcp.f32 %v378_v60 }
 0x523   :  { %v381_v61 = vpop.xlane.xlu1 %380 }
 0x524   :  { %2580 = vrcp.f32 %v381_v61 }
 0x52c   :  { %v2579_v62 = vpop.eup %2578 }
 0x52d   :  { %v384_v1 = vmul.f32 %v2579_v62, %v2575_v56 }
 0x52e   :  { %v2581_v63 = vpop.eup %2580 }
 0x52f   :  { %v385_v2 = vmul.f32 %v2581_v63, %v2577_v58  ;;  %v2146_v63 = vld [vmem:[#allocation2 + $0x76] ss:$0 sm:$0xff] }
 0x531   :  { %v386_v4 = vpack.c.bf16 %v385_v2, %v384_v1 }
 0x533   :  { %2334 = vmatmul.mubr.msk.bf16.vlgmr.msra.gmra.mrb[4].mxu0 %vm362_vm6, %v386_v4 }
 0x534   :  { %2346 = vmatpush3.bf16.msra.mxu0 %v2540_v3  ;;  %2349 = vmatprep.mubr.msk.bf16.mxu0 %vm2660_vm0, %v2659_v0 }
 0x535   :  { %2347 = vmatprep.subr.bf16.mxu0 %v2659_v0 }
 0x538   :  { %2348 = vmatpush3.bf16.msra.mxu0 %v2541_v5 }
 0x539   :  { %2361 = vmatprep.subr.bf16.mxu0 %v2659_v0 }
 0x53b   :  { %2350 = vmatmul.mubr.msk.bf16.vlgmr.msra.gmra.mrb[8].mxu0 %vm93_vm2, %v2738_v49 }
 0x53c   :  { %2363 = vmatprep.mubr.msk.bf16.mxu0 %vm2660_vm0, %v2659_v0 }
 0x606   :  { %v429_v6 = vpop.f32.mrb[4].mxu0 }
 0x607   :  { %v2335_v7 = vpop.f32.mrb[5].mxu0 }
 0x608   :  { %v432_v8 = vpop.f32.mrb[6].mxu0 }
 0x609   :  { %v438_v9 = vpack.c.bf16 %v432_v8, %v429_v6  ;;  %v2336_v10 = vpop.f32.mrb[7].mxu0 }
 0x60e   :  { %v556_v12 = vpop.f32.mrb[8].mxu0 }
 0x60f   :  { %v2351_v13 = vpop.f32.mrb[9].mxu0  ;;  %v557_v15 = vadd.f32 %v2132_v11, %v556_v12 }
 0x610   :  { %v559_v14 = vpop.f32.mrb[10].mxu0 }
 0x611   :  { %v560_v16 = vadd.f32 %v2132_v11, %v559_v14  ;;  %v2352_v17 = vpop.f32.mrb[11].mxu0 }
 0x613   :  { %v626_v18 = vpack.c.bf16 %v560_v16, %v557_v15 }
 0x615   :  { %v631_v20 = vsel %vm314_vm4, %v626_v18, 0  ;;  %v2544_v18 = vld [vmem:[%s3092_s2 + $0x70] sm:$0xff]  }
 0x616   :  { %2362 = vmatpush3.bf16.xpose.msra.mxu0 %v631_v20  ;;  %v2545_v20 = vld [vmem:[%s3092_s2 + $0x78] sm:$0xff]  }
 0x617   :  { %2373 = vmatprep.subr.bf16.mxu0 %v2659_v0 }
 0x61d   :  { %2364 = vmatmul.mubr.msk.bf16.vlgmr.msra.gmra.mrb[12].mxu0 %vm314_vm4, %v625_v39 }
 0x61e   :  { %2375 = vmatprep.mubr.msk.bf16.mxu0 %vm2660_vm0, %v2659_v0  ;;  %2374 = vmatpush3.bf16.msra.mxu0 %v2543_v50 }
 0x61f   :  { %2385 = vmatprep.subr.bf16.mxu0 %v2659_v0 }
 0x6f0   :  { %v667_v49 = vpop.f32.mrb[12].mxu0 }
 0x6f1   :  { %v668_v23 = vadd.f32 %v667_v49, %v2796_v21  ;;  %v2365_v25 = vpop.f32.mrb[13].mxu0 }
 0x6f2   :  { %v670_v26 = vpop.f32.mrb[14].mxu0 }
 0x6f3   :  { %v671_v27 = vadd.f32 %v670_v26, %v2798_v24  ;;  %v2366_v28 = vpop.f32.mrb[15].mxu0  ;;  %v674_v29 = vsel %vm362_vm6, %v668_v23, -inf }
 0x6f4   :  { %675 = vmax.xlane.f32.xlu0 %v674_v29 }
 0x6f5   :  { %v677_v30 = vsel %vm366_vm7, %v671_v27, -inf }
 0x6f6   :  { %678 = vmax.xlane.f32.xlu1 %v677_v30 }
 0x781   :  { %v676_v31 = vpop.xlane.xlu0 %675 }
 0x782   :  { %v680_v32 = vsub.f32 %v668_v23, %v676_v31 }
 0x783   :  { %v679_v33 = vpop.xlane.xlu1 %678 }
 0x784   :  { %v682_v34 = vmul.f32 1.442695, %v680_v32  ;;  %v681_v35 = vsub.f32 %v671_v27, %v679_v33 }
 0x786   :  { %2582 = vpow2.f32 %v682_v34  ;;  %v684_v36 = vmul.f32 1.442695, %v681_v35  ;;  %v2546_v34 = vld [vmem:[%s3092_s2 + $0x80] sm:$0xff]   ;;  %v2547_v35 = vld [vmem:[%s3092_s2 + $0x88] sm:$0xff]  }
 0x788   :  { %2584 = vpow2.f32 %v684_v36  ;;  %v2548_v36 = vld [vmem:[%s3092_s2 + $0x90] sm:$0xff]  }
 0x790   :  { %v2583_v37 = vpop.eup %2582 }
 0x791   :  { %v686_v38 = vsel %vm362_vm6, %v2583_v37, 0.0 }
 0x792   :  { %v2585_v39 = vpop.eup %2584  ;;  %687 = vadd.xlane.f32.xlu0 %v686_v38  ;;  %v2147_v38 = vld [vmem:[#allocation2 + $0x77] ss:$0 sm:$0xff] }
 0x793   :  { %v689_v40 = vsel %vm366_vm7, %v2585_v39, 0.0 }
 0x794   :  { %690 = vadd.xlane.f32.xlu1 %v689_v40 }
 0x81f   :  { %v688_v41 = vpop.xlane.xlu0 %687 }
 0x820   :  { %2586 = vrcp.f32 %v688_v41 }
 0x821   :  { %v691_v42 = vpop.xlane.xlu1 %690 }
 0x822   :  { %2588 = vrcp.f32 %v691_v42 }
 0x82a   :  { %v2587_v43 = vpop.eup %2586 }
 0x82b   :  { %v694_v45 = vmul.f32 %v2587_v43, %v2583_v37  ;;  %v2549_v37 = vld [vmem:[%s3092_s2 + $0x98] sm:$0xff]  }
 0x82c   :  { %v2589_v44 = vpop.eup %2588 }
 0x82d   :  { %v695_v46 = vmul.f32 %v2589_v44, %v2585_v39 }
 0x82f   :  { %v696_v48 = vpack.c.bf16 %v695_v46, %v694_v45 }
 0x831   :  { %2370 = vmatmul.mubr.msk.bf16.vlgmr.msra.gmra.mrb[24].mxu1 %vm362_vm6, %v696_v48 }
 0x832   :  { %2380 = vmatpush3.bf16.msra.mxu1 %v2542_v47  ;;  %2381 = vmatprep.mubr.msk.bf16.mxu1 %vm2660_vm0, %v2659_v0 }
 0x833   :  { %2393 = vmatprep.subr.bf16.mxu1 %v2659_v0 }
 0x839   :  { %2382 = vmatmul.mubr.msk.bf16.vlgmr.msra.gmra.mrb[28].mxu1 %vm314_vm4, %v438_v9 }
 0x83a   :  { %2401 = vmatprep.mubr.msk.bf16.mxu1 %vm2660_vm0, %v2659_v0  ;;  %2394 = vmatpush3.bf16.msra.mxu1 %v2546_v34 }
 0x83b   :  { %2395 = vmatprep.subr.bf16.mxu1 %v2659_v0 }
 0x83e   :  { %2396 = vmatpush3.bf16.msra.mxu1 %v2547_v35  ;;  %v2165_v35 = vld [vmem:[#allocation2 + $0x82] ss:$0 sm:$0xff] }
 0x83f   :  { %2397 = vmatprep.subr.bf16.mxu1 %v2659_v0 }
 0x842   :  { %2398 = vmatpush3.bf16.msra.mxu1 %v2548_v36 }
 0x843   :  { %2399 = vmatprep.subr.bf16.mxu1 %v2659_v0 }
 0x846   :  { %2400 = vmatpush3.bf16.msra.mxu1 %v2549_v37 }
 0x847   :  { %2421 = vmatprep.subr.bf16.mxu1 %v2659_v0 }
 0x904   :  { %v738_v51 = vpop.f32.mrb[24].mxu1 }
 0x905   :  { %v2371_v52 = vpop.f32.mrb[25].mxu1 }
 0x906   :  { %v741_v53 = vpop.f32.mrb[26].mxu1 }
 0x907   :  { %v747_v54 = vpack.c.bf16 %v741_v53, %v738_v51  ;;  %v2372_v55 = vpop.f32.mrb[27].mxu1 }
 0x909   :  { %2376 = vmatmul.mubr.msk.bf16.vlgmr.msra.gmra.mrb[16].mxu0 %vm314_vm4, %v747_v54 }
 0x90a   :  { %2389 = vmatprep.mubr.msk.bf16.mxu0 %vm2660_vm0, %v2659_v0  ;;  %2386 = vmatpush3.bf16.msra.mxu0 %v2544_v18 }
 0x90b   :  { %2387 = vmatprep.subr.bf16.mxu0 %v2659_v0 }
 0x90c   :  { %v841_v56 = vpop.f32.mrb[28].mxu1 }
 0x90d   :  { %v2383_v57 = vpop.f32.mrb[29].mxu1 }
 0x90e   :  { %v844_v58 = vpop.f32.mrb[30].mxu1  ;;  %2388 = vmatpush3.bf16.msra.mxu0 %v2545_v20 }
 0x90f   :  { %v2384_v59 = vpop.f32.mrb[31].mxu1  ;;  %2405 = vmatprep.subr.bf16.mxu0 %v2659_v0 }
 0x9dc   :  { %v791_v60 = vpop.f32.mrb[16].mxu0 }
 0x9dd   :  { %v842_v61 = vadd.f32 %v841_v56, %v791_v60  ;;  %v2377_v62 = vpop.f32.mrb[17].mxu0 }
 0x9de   :  { %v794_v1 = vpop.f32.mrb[18].mxu0 }
 0x9df   :  { %v848_v2 = vadd.f32 %v842_v61, %v2715_v19  ;;  %v845_v3 = vadd.f32 %v844_v58, %v794_v1  ;;  %v2378_v4 = vpop.f32.mrb[19].mxu0  ;;  %v2156_v58 = vld [vmem:[#allocation2 + $0x78] ss:$0 sm:$0xff] }
 0x9e1   :  { %v2858_v5 = vadd.f32 %v2146_v63, %v848_v2  ;;  %v849_v6 = vadd.f32 %v845_v3, %v2717_v22 }
 0x9e3   :  { %v2861_v7 = vadd.f32 %v2146_v63, %v849_v6  ;;  %v857_v8 = vsel %vm93_vm2, %v2858_v5, 0.0 }
 0x9e4   :  { %858 = vadd.xlane.f32.xlu0 %v857_v8 }
 0x9e5   :  { %v860_v9 = vsel %vm97_vm3, %v2861_v7, 0.0 }
 0x9e6   :  { %861 = vadd.xlane.f32.xlu1 %v860_v9 }
 0xa71   :  { %v859_v10 = vpop.xlane.xlu0 %858 }
 0xa72   :  { %v863_v11 = vmul.f32 0.03125, %v859_v10 }
 0xa73   :  { %v862_v12 = vpop.xlane.xlu1 %861 }
 0xa74   :  { %v865_v19 = vsub.f32 %v2858_v5, %v863_v11  ;;  %v864_v13 = vmul.f32 0.03125, %v862_v12 }
 0xa76   :  { %v866_v14 = vsub.f32 %v2861_v7, %v864_v13  ;;  %v867_v15 = vmul.f32 %v865_v19, %v865_v19 }
 0xa78   :  { %v869_v22 = vsel %vm93_vm2, %v867_v15, 0.0  ;;  %v868_v16 = vmul.f32 %v866_v14, %v866_v14  ;;  %v2551_v15 = vld [vmem:[%s3092_s2 + $0xc0] sm:$0xff]  }
 0xa79   :  { %870 = vadd.xlane.f32.xlu0 %v869_v22  ;;  %v2552_v22 = vld [vmem:[%s3092_s2 + $0xa8] sm:$0xff]  }
 0xa7a   :  { %v872_v17 = vsel %vm97_vm3, %v868_v16, 0.0  ;;  %v2553_v16 = vld [vmem:[%s3092_s2 + $0xc8] sm:$0xff]  }
 0xa7b   :  { %873 = vadd.xlane.f32.xlu1 %v872_v17 }
 0xb06   :  { %v871_v49 = vpop.xlane.xlu0 %870 }
 0xb07   :  { %v875_v23 = vmul.f32 0.03125, %v871_v49 }
 0xb08   :  { %v874_v25 = vpop.xlane.xlu1 %873 }
 0xb09   :  { %v877_v26 = vadd.f32 1e-06, %v875_v23  ;;  %v876_v27 = vmul.f32 0.03125, %v874_v25 }
 0xb0b   :  { %2590 = vrsqrt.f32 %v877_v26  ;;  %v878_v28 = vadd.f32 1e-06, %v876_v27 }
 0xb0d   :  { %2592 = vrsqrt.f32 %v878_v28 }
 0xb15   :  { %v2591_v29 = vpop.eup %2590 }
 0xb16   :  { %v881_v31 = vmul.f32 %v2591_v29, %v865_v19 }
 0xb17   :  { %v2593_v30 = vpop.eup %2592 }
 0xb18   :  { %v882_v32 = vmul.f32 %v2593_v30, %v866_v14  ;;  %v2550_v14 = vld [vmem:[%s3092_s2 + $0xa0] sm:$0xff]   ;;  %v2554_v30 = vld [vmem:[%s3092_s2 + $0xb0] sm:$0xff]  }
 0xb1a   :  { %v887_v33 = vpack.c.bf16 %v882_v32, %v881_v31  ;;  %v2555_v32 = vld [vmem:[%s3092_s2 + $0xb8] sm:$0xff]  }
 0xb1c   :  { %2390 = vmatmul.mubr.msk.bf16.vlgmr.msra.gmra.mrb[20].mxu0 %vm93_vm2, %v887_v33  ;;  %v2157_v33 = vld [vmem:[#allocation2 + $0x80] ss:$0 sm:$0xff] }
 0xb1d   :  { %2409 = vmatprep.mubr.msk.bf16.mxu0 %vm2660_vm0, %v2659_v0  ;;  %2406 = vmatpush3.bf16.msra.mxu0 %v2550_v14 }
 0xb1e   :  { %2407 = vmatprep.subr.bf16.mxu0 %v2659_v0 }
 0xb21   :  { %2408 = vmatpush3.bf16.msra.mxu0 %v2552_v22 }
 0xb22   :  { %2413 = vmatprep.subr.bf16.mxu0 %v2659_v0 }
 0xbef   :  { %v942_v39 = vpop.f32.mrb[20].mxu0 }
 0xbf0   :  { %v943_v40 = vadd.f32 %v2147_v38, %v942_v39  ;;  %v2391_v41 = vpop.f32.mrb[21].mxu0 }
 0xbf1   :  { %v945_v42 = vpop.f32.mrb[22].mxu0 }
 0xbf2   :  { %v951_v43 = vmul.f32 0.70710677, %v943_v40  ;;  %v946_v44 = vadd.f32 %v2147_v38, %v945_v42  ;;  %v2392_v45 = vpop.f32.mrb[23].mxu0  ;;  %v949_v51 = vmul.f32 0.5, %v943_v40 }
 0xbf4   :  { %2594 = verf.f32 %v951_v43  ;;  %v952_v46 = vmul.f32 0.70710677, %v946_v44  ;;  %v950_v52 = vmul.f32 0.5, %v946_v44 }
 0xbf6   :  { %2596 = verf.f32 %v952_v46 }
 0xbfe   :  { %v2595_v47 = vpop.eup %2594 }
 0xbff   :  { %v955_v48 = vadd.f32 1.0, %v2595_v47 }
 0xc00   :  { %v2597_v50 = vpop.eup %2596 }
 0xc01   :  { %v956_v53 = vadd.f32 1.0, %v2597_v50  ;;  %v957_v54 = vmul.f32 %v955_v48, %v949_v51  ;;  %v2161_v51 = vld [vmem:[#allocation2 + $0x81] ss:$0 sm:$0xff] }
 0xc03   :  { %v958_v55 = vmul.f32 %v956_v53, %v950_v52 }
 0xc05   :  { %v967_v56 = vpack.c.bf16 %v958_v55, %v957_v54 }
 0xc07   :  { %2402 = vmatmul.mubr.msk.bf16.vlgmr.msra.gmra.mrb[32].mxu1 %vm46_vm1, %v967_v56 }
 0xc08   :  { %2425 = vmatprep.mubr.msk.bf16.mxu1 %vm2660_vm0, %v2659_v0  ;;  %2422 = vmatpush3.bf16.msra.mxu1 %v2551_v15 }
 0xc09   :  { %2423 = vmatprep.subr.bf16.mxu1 %v2659_v0 }
 0xc0c   :  { %2424 = vmatpush3.bf16.msra.mxu1 %v2553_v16 }
 0xc0d   :  { %2435 = vmatprep.subr.bf16.mxu1 %v2659_v0 }
 0xcda   :  { %v1029_v57 = vpop.f32.mrb[32].mxu1 }
 0xcdb   :  { %v1036_v59 = vadd.f32 %v1029_v57, %v2858_v5  ;;  %v2403_v60 = vpop.f32.mrb[33].mxu1 }
 0xcdc   :  { %v1032_v61 = vpop.f32.mrb[34].mxu1  ;;  %v2556_v60 = vld [vmem:[%s3092_s2 + $0xd0] sm:$0xff]  }
 0xcdd   :  { %v2902_v62 = vadd.f32 %v2156_v58, %v1036_v59  ;;  %v1037_v63 = vadd.f32 %v1032_v61, %v2861_v7  ;;  %v2404_v1 = vpop.f32.mrb[35].mxu1  ;;  %v2557_v61 = vld [vmem:[%s3092_s2 + $0xd8] sm:$0xff]  }
 0xcde   :  { %v2559_v1 = vld [vmem:[%s3092_s2 + $0xf8] sm:$0xff]  }
 0xcdf   :  { %v2905_v2 = vadd.f32 %v2156_v58, %v1037_v63  ;;  %v1045_v3 = vsel %vm93_vm2, %v2902_v62, 0.0  ;;  %v2558_v63 = vld [vmem:[%s3092_s2 + $0xf0] sm:$0xff]  }
 0xce0   :  { %1046 = vadd.xlane.f32.xlu0 %v1045_v3 }
 0xce1   :  { %v1048_v4 = vsel %vm97_vm3, %v2905_v2, 0.0 }
 0xce2   :  { %1049 = vadd.xlane.f32.xlu1 %v1048_v4 }
 0xd6d   :  { %v1047_v6 = vpop.xlane.xlu0 %1046 }
 0xd6e   :  { %v1051_v8 = vmul.f32 0.03125, %v1047_v6 }
 0xd6f   :  { %v1050_v5 = vpop.xlane.xlu1 %1049 }
 0xd70   :  { %v1053_v9 = vsub.f32 %v2902_v62, %v1051_v8  ;;  %v1052_v10 = vmul.f32 0.03125, %v1050_v5 }
 0xd72   :  { %v1054_v11 = vsub.f32 %v2905_v2, %v1052_v10  ;;  %v1055_v7 = vmul.f32 %v1053_v9, %v1053_v9 }
 0xd74   :  { %v1057_v12 = vsel %vm93_vm2, %v1055_v7, 0.0  ;;  %v1056_v19 = vmul.f32 %v1054_v11, %v1054_v11  ;;  %v2171_v7 = vld [vmem:[#allocation2 + $0x83] ss:$0 sm:$0xff] }
 0xd75   :  { %1058 = vadd.xlane.f32.xlu0 %v1057_v12 }
 0xd76   :  { %v1060_v13 = vsel %vm97_vm3, %v1056_v19, 0.0 }
 0xd77   :  { %1061 = vadd.xlane.f32.xlu1 %v1060_v13 }
 0xe02   :  { %v1059_v17 = vpop.xlane.xlu0 %1058 }
 0xe03   :  { %v1063_v18 = vmul.f32 0.03125, %v1059_v17  ;;  %v2179_v17 = vld [vmem:[#allocation2 + $0x85] ss:$0 sm:$0xff] }
 0xe04   :  { %v1062_v20 = vpop.xlane.xlu1 %1061 }
 0xe05   :  { %v1065_v49 = vadd.f32 1e-06, %v1063_v18  ;;  %v1064_v23 = vmul.f32 0.03125, %v1062_v20 }
 0xe07   :  { %2598 = vrsqrt.f32 %v1065_v49  ;;  %v1066_v25 = vadd.f32 1e-06, %v1064_v23 }
 0xe09   :  { %2600 = vrsqrt.f32 %v1066_v25 }
 0xe11   :  { %v2599_v26 = vpop.eup %2598 }
 0xe12   :  { %v1069_v28 = vmul.f32 %v2599_v26, %v1053_v9 }
 0xe13   :  { %v2601_v27 = vpop.eup %2600 }
 0xe14   :  { %v1070_v29 = vmul.f32 %v2601_v27, %v1054_v11 }
 0xe16   :  { %v2934_v31 = vpack.c.bf16 %v1070_v29, %v1069_v28 }
 0xe18   :  { %2410 = vmatmul.mubr.msk.bf16.vlgmr.msra.gmra.mrb[24].mxu0 %vm93_vm2, %v2934_v31  ;;  %2426 = vmatmul.mubr.msk.bf16.vlgmr.msra.gmra.mrb[36].mxu1 %vm93_vm2, %v2934_v31 }
 0xe19   :  { %2414 = vmatpush3.bf16.msra.mxu0 %v2554_v30  ;;  %2417 = vmatprep.mubr.msk.bf16.mxu0 %vm2660_vm0, %v2659_v0 }
 0xe1a   :  { %2415 = vmatprep.subr.bf16.mxu0 %v2659_v0  ;;  %2437 = vmatprep.mubr.msk.bf16.mxu1 %vm2660_vm0, %v2659_v0 }
 0xe1d   :  { %2416 = vmatpush3.bf16.msra.mxu0 %v2555_v32 }
 0xe1e   :  { %2429 = vmatprep.subr.bf16.mxu0 %v2659_v0 }
 0xe20   :  { %2418 = vmatmul.mubr.msk.bf16.vlgmr.msra.gmra.mrb[28].mxu0 %vm93_vm2, %v2934_v31 }
 0xe21   :  { %2431 = vmatprep.mubr.msk.bf16.mxu0 %vm2660_vm0, %v2659_v0 }
 0xeeb   :  { %v1130_v34 = vpop.f32.mrb[24].mxu0  ;;  %v1254_v36 = vpop.f32.mrb[36].mxu1 }
 0xeec   :  { %v2411_v37 = vpop.f32.mrb[25].mxu0  ;;  %v2427_v38 = vpop.f32.mrb[37].mxu1  ;;  %v1131_v41 = vadd.f32 %v2157_v33, %v1130_v34  ;;  %v1255_v42 = vadd.f32 %v2165_v35, %v1254_v36 }
 0xeed   :  { %v1133_v39 = vpop.f32.mrb[26].mxu0  ;;  %v1257_v40 = vpop.f32.mrb[38].mxu1 }
 0xeee   :  { %v1134_v43 = vadd.f32 %v2157_v33, %v1133_v39  ;;  %v1258_v44 = vadd.f32 %v2165_v35, %v1257_v40  ;;  %v2412_v45 = vpop.f32.mrb[27].mxu0  ;;  %v2428_v46 = vpop.f32.mrb[39].mxu1 }
 0xeef   :  { %v2560_v46 = vld [vmem:[%s3092_s2 + $0xe0] sm:$0xff]  }
 0xef0   :  { %v1261_v47 = vpack.c.bf16 %v1134_v43, %v1131_v41  ;;  %v1333_v48 = vpack.c.bf16 %v1258_v44, %v1255_v42 }
 0xef2   :  { %v1338_v50 = vsel %vm391_vm5, %v1333_v48, 0  ;;  %v2561_v48 = vld [vmem:[%s3092_s2 + $0xe8] sm:$0xff]  }
 0xef3   :  { %v1192_v52 = vpop.f32.mrb[28].mxu0  ;;  %2436 = vmatpush3.bf16.msra.mxu1 %v1338_v50 }
 0xef4   :  { %v2419_v53 = vpop.f32.mrb[29].mxu0  ;;  %2449 = vmatprep.subr.bf16.mxu1 %v2659_v0  ;;  %v1193_v55 = vadd.f32 %v2161_v51, %v1192_v52 }
 0xef5   :  { %v1195_v54 = vpop.f32.mrb[30].mxu0 }
 0xef6   :  { %v1196_v56 = vadd.f32 %v2161_v51, %v1195_v54  ;;  %v2420_v57 = vpop.f32.mrb[31].mxu0 }
 0xef8   :  { %v1262_v58 = vpack.c.bf16 %v1196_v56, %v1193_v55  ;;  %v2175_v55 = vld [vmem:[#allocation2 + $0x84] ss:$0 sm:$0xff] }
 0xefa   :  { %v1267_v59 = vsel %vm314_vm4, %v1262_v58, 0 }
 0xefb   :  { %2430 = vmatpush3.bf16.xpose.msra.mxu0 %v1267_v59 }
 0xefc   :  { %2441 = vmatprep.subr.bf16.mxu0 %v2659_v0 }
 0xf02   :  { %2432 = vmatmul.mubr.msk.bf16.vlgmr.msra.gmra.mrb[32].mxu0 %vm314_vm4, %v1261_v47 }
 0xf03   :  { %2442 = vmatpush3.bf16.msra.mxu0 %v2556_v60  ;;  %2445 = vmatprep.mubr.msk.bf16.mxu0 %vm2660_vm0, %v2659_v0 }
 0xf04   :  { %2443 = vmatprep.subr.bf16.mxu0 %v2659_v0 }
 0xf07   :  { %2444 = vmatpush3.bf16.msra.mxu0 %v2557_v61 }
 0xf08   :  { %2457 = vmatprep.subr.bf16.mxu0 %v2659_v0 }
 0xf0a   :  { %2446 = vmatmul.mubr.msk.bf16.vlgmr.msra.gmra.mrb[36].mxu0 %vm93_vm2, %v2934_v31 }
 0xf0b   :  { %2458 = vmatpush3.bf16.msra.mxu0 %v2558_v63  ;;  %2461 = vmatprep.mubr.msk.bf16.mxu0 %vm2660_vm0, %v2659_v0 }
 0xf0c   :  { %2459 = vmatprep.subr.bf16.mxu0 %v2659_v0 }
 0xf0f   :  { %2460 = vmatpush3.bf16.msra.mxu0 %v2559_v1 }
 0xf10   :  { %2471 = vmatprep.subr.bf16.mxu0 %v2659_v0 }
 0xf12   :  { %2462 = vmatmul.mubr.msk.bf16.vlgmr.msra.gmra.mrb[40].mxu0 %vm93_vm2, %v2934_v31 }
 0xf13   :  { %2473 = vmatprep.mubr.msk.bf16.mxu0 %vm2660_vm0, %v2659_v0 }
 0xfd5   :  { %v1303_v3 = vpop.f32.mrb[32].mxu0 }
 0xfd6   :  { %v1304_v4 = vadd.f32 %v1303_v3, %v2796_v21  ;;  %v2433_v6 = vpop.f32.mrb[33].mxu0 }
 0xfd7   :  { %v1306_v8 = vpop.f32.mrb[34].mxu0 }
 0xfd8   :  { %v1307_v5 = vadd.f32 %v1306_v8, %v2798_v24  ;;  %v2434_v9 = vpop.f32.mrb[35].mxu0  ;;  %v1310_v10 = vsel %vm362_vm6, %v1304_v4, -inf }
 0xfd9   :  { %1311 = vmax.xlane.f32.xlu0 %v1310_v10 }
 0xfda   :  { %v1313_v11 = vsel %vm366_vm7, %v1307_v5, -inf }
 0xfdb   :  { %1314 = vmax.xlane.f32.xlu1 %v1313_v11 }
 0xfdd   :  { %v1439_v12 = vpop.f32.mrb[36].mxu0 }
 0xfde   :  { %v2447_v19 = vpop.f32.mrb[37].mxu0  ;;  %v2988_v14 = vadd.f32 %v2171_v7, %v1439_v12 }
 0xfdf   :  { %v1442_v13 = vpop.f32.mrb[38].mxu0 }
 0xfe0   :  { %v2990_v15 = vadd.f32 %v2171_v7, %v1442_v13  ;;  %v2448_v22 = vpop.f32.mrb[39].mxu0 }
 0xfe2   :  { %v1570_v16 = vpack.c.bf16 %v2990_v15, %v2988_v14 }
 0xfe5   :  { %v1563_v18 = vpop.f32.mrb[40].mxu0 }
 0xfe6   :  { %v2463_v20 = vpop.f32.mrb[41].mxu0  ;;  %v1564_v23 = vadd.f32 %v2179_v17, %v1563_v18 }
 0xfe7   :  { %v1566_v49 = vpop.f32.mrb[42].mxu0 }
 0xfe8   :  { %v1567_v25 = vadd.f32 %v2179_v17, %v1566_v49  ;;  %v2464_v26 = vpop.f32.mrb[43].mxu0 }
 0xfea   :  { %v1642_v27 = vpack.c.bf16 %v1567_v25, %v1564_v23  ;;  %v2562_v25 = vld [vmem:[%s3092_s2 + $0x100] sm:$0xff]  }
 0xfec   :  { %v1647_v28 = vsel %vm391_vm5, %v1642_v27, 0  ;;  %v2563_v27 = vld [vmem:[%s3092_s2 + $0x108] sm:$0xff]  }
 0xfed   :  { %2472 = vmatpush3.bf16.msra.mxu0 %v1647_v28 }
 0xfee   :  { %2483 = vmatprep.subr.bf16.mxu0 %v2659_v0 }
0x1066   :  { %v1312_v29 = vpop.xlane.xlu0 %1311 }
0x1067   :  { %v1316_v30 = vsub.f32 %v1304_v4, %v1312_v29 }
0x1068   :  { %v1315_v32 = vpop.xlane.xlu1 %1314 }
0x1069   :  { %v1318_v33 = vmul.f32 1.442695, %v1316_v30  ;;  %v1317_v34 = vsub.f32 %v1307_v5, %v1315_v32 }
0x106b   :  { %2602 = vpow2.f32 %v1318_v33  ;;  %v1320_v35 = vmul.f32 1.442695, %v1317_v34 }
0x106d   :  { %2604 = vpow2.f32 %v1320_v35 }
0x1075   :  { %v2603_v36 = vpop.eup %2602 }
0x1076   :  { %v1322_v37 = vsel %vm362_vm6, %v2603_v36, 0.0 }
0x1077   :  { %v2605_v38 = vpop.eup %2604  ;;  %1323 = vadd.xlane.f32.xlu0 %v1322_v37 }
0x1078   :  { %v1325_v39 = vsel %vm366_vm7, %v2605_v38, 0.0 }
0x1079   :  { %1326 = vadd.xlane.f32.xlu1 %v1325_v39 }
0x1104   :  { %v1324_v40 = vpop.xlane.xlu0 %1323 }
0x1105   :  { %2606 = vrcp.f32 %v1324_v40 }
0x1106   :  { %v1327_v41 = vpop.xlane.xlu1 %1326 }
0x1107   :  { %2608 = vrcp.f32 %v1327_v41  ;;  %v2189_v41 = vld [vmem:[#allocation2 + $0x86] ss:$0 sm:$0xff] }
0x110f   :  { %v2607_v42 = vpop.eup %2606 }
0x1110   :  { %v1330_v44 = vmul.f32 %v2607_v42, %v2603_v36 }
0x1111   :  { %v2609_v43 = vpop.eup %2608 }
0x1112   :  { %v1331_v45 = vmul.f32 %v2609_v43, %v2605_v38 }
0x1114   :  { %v1332_v47 = vpack.c.bf16 %v1331_v45, %v1330_v44 }
0x1116   :  { %2438 = vmatmul.mubr.msk.bf16.vlgmr.msra.gmra.mrb[40].mxu1 %vm362_vm6, %v1332_v47 }
0x1117   :  { %2450 = vmatpush3.bf16.msra.mxu1 %v2560_v46  ;;  %2453 = vmatprep.mubr.msk.bf16.mxu1 %vm2660_vm0, %v2659_v0 }
0x1118   :  { %2451 = vmatprep.subr.bf16.mxu1 %v2659_v0 }
0x111b   :  { %2452 = vmatpush3.bf16.msra.mxu1 %v2561_v48 }
0x111c   :  { %2465 = vmatprep.subr.bf16.mxu1 %v2659_v0 }
0x111e   :  { %2454 = vmatmul.mubr.msk.bf16.vlgmr.msra.gmra.mrb[44].mxu1 %vm93_vm2, %v2934_v31 }
0x111f   :  { %2467 = vmatprep.mubr.msk.bf16.mxu1 %vm2660_vm0, %v2659_v0 }
0x11e9   :  { %v1374_v50 = vpop.f32.mrb[40].mxu1 }
0x11ea   :  { %v2439_v51 = vpop.f32.mrb[41].mxu1 }
0x11eb   :  { %v1377_v52 = vpop.f32.mrb[42].mxu1 }
0x11ec   :  { %v1383_v53 = vpack.c.bf16 %v1377_v52, %v1374_v50  ;;  %v2440_v54 = vpop.f32.mrb[43].mxu1 }
0x11f1   :  { %v1501_v56 = vpop.f32.mrb[44].mxu1 }
0x11f2   :  { %v2455_v57 = vpop.f32.mrb[45].mxu1  ;;  %v1502_v59 = vadd.f32 %v2175_v55, %v1501_v56 }
0x11f3   :  { %v1504_v58 = vpop.f32.mrb[46].mxu1 }
0x11f4   :  { %v1505_v60 = vadd.f32 %v2175_v55, %v1504_v58  ;;  %v2456_v61 = vpop.f32.mrb[47].mxu1 }
0x11f5   :  { %v2565_v61 = vld [vmem:[%s3092_s2 + $0x118] sm:$0xff]  }
0x11f6   :  { %v1571_v63 = vpack.c.bf16 %v1505_v60, %v1502_v59  ;;  %v2564_v60 = vld [vmem:[%s3092_s2 + $0x110] sm:$0xff]  }
0x11f8   :  { %v1576_v1 = vsel %vm314_vm4, %v1571_v63, 0 }
0x11f9   :  { %2466 = vmatpush3.bf16.xpose.msra.mxu1 %v1576_v1 }
0x11fa   :  { %2477 = vmatprep.subr.bf16.mxu1 %v2659_v0 }
0x1200   :  { %2468 = vmatmul.mubr.msk.bf16.vlgmr.msra.gmra.mrb[48].mxu1 %vm314_vm4, %v1570_v16 }
0x1201   :  { %2479 = vmatprep.mubr.msk.bf16.mxu1 %vm2660_vm0, %v2659_v0  ;;  %2478 = vmatpush3.bf16.msra.mxu1 %v2563_v27 }
0x1202   :  { %2489 = vmatprep.subr.bf16.mxu1 %v2659_v0 }
0x12d3   :  { %v1612_v31 = vpop.f32.mrb[48].mxu1 }
0x12d4   :  { %v1613_v3 = vadd.f32 %v1612_v31, %v2796_v21  ;;  %v2469_v4 = vpop.f32.mrb[49].mxu1 }
0x12d5   :  { %v1615_v6 = vpop.f32.mrb[50].mxu1 }
0x12d6   :  { %v1616_v8 = vadd.f32 %v1615_v6, %v2798_v24  ;;  %v2470_v5 = vpop.f32.mrb[51].mxu1  ;;  %v1619_v9 = vsel %vm362_vm6, %v1613_v3, -inf }
0x12d7   :  { %1620 = vmax.xlane.f32.xlu0 %v1619_v9 }
0x12d8   :  { %v1622_v10 = vsel %vm366_vm7, %v1616_v8, -inf }
0x12d9   :  { %1623 = vmax.xlane.f32.xlu1 %v1622_v10 }
0x1364   :  { %v1621_v11 = vpop.xlane.xlu0 %1620 }
0x1365   :  { %v1625_v7 = vsub.f32 %v1613_v3, %v1621_v11 }
0x1366   :  { %v1624_v12 = vpop.xlane.xlu1 %1623 }
0x1367   :  { %v1627_v19 = vmul.f32 1.442695, %v1625_v7  ;;  %v1626_v13 = vsub.f32 %v1616_v8, %v1624_v12  ;;  %v2566_v7 = vld [vmem:[%s3092_s2 + $0x120] sm:$0xff]   ;;  %v2567_v12 = vld [vmem:[%s3092_s2 + $0x128] sm:$0xff]  }
0x1369   :  { %2610 = vpow2.f32 %v1627_v19  ;;  %v1629_v14 = vmul.f32 1.442695, %v1626_v13  ;;  %v2568_v19 = vld [vmem:[%s3092_s2 + $0x130] sm:$0xff]   ;;  %v2569_v13 = vld [vmem:[%s3092_s2 + $0x138] sm:$0xff]  }
0x136b   :  { %2612 = vpow2.f32 %v1629_v14  ;;  %v2190_v14 = vld [vmem:[#allocation2 + $0x87] ss:$0 sm:$0xff] }
0x1373   :  { %v2611_v21 = vpop.eup %2610 }
0x1374   :  { %v1631_v15 = vsel %vm362_vm6, %v2611_v21, 0.0 }
0x1375   :  { %v2613_v22 = vpop.eup %2612  ;;  %1632 = vadd.xlane.f32.xlu0 %v1631_v15 }
0x1376   :  { %v1634_v24 = vsel %vm366_vm7, %v2613_v22, 0.0 }
0x1377   :  { %1635 = vadd.xlane.f32.xlu1 %v1634_v24 }
0x1402   :  { %v1633_v16 = vpop.xlane.xlu0 %1632 }
0x1403   :  { %2614 = vrcp.f32 %v1633_v16 }
0x1404   :  { %v1636_v17 = vpop.xlane.xlu1 %1635 }
0x1405   :  { %2616 = vrcp.f32 %v1636_v17 }
0x140d   :  { %v2615_v18 = vpop.eup %2614 }
0x140e   :  { %v1639_v49 = vmul.f32 %v2615_v18, %v2611_v21 }
0x140f   :  { %v2617_v20 = vpop.eup %2616 }
0x1410   :  { %v1640_v23 = vmul.f32 %v2617_v20, %v2613_v22 }
0x1412   :  { %v1641_v26 = vpack.c.bf16 %v1640_v23, %v1639_v49 }
0x1414   :  { %2474 = vmatmul.mubr.msk.bf16.vlgmr.msra.gmra.mrb[44].mxu0 %vm362_vm6, %v1641_v26 }
0x1415   :  { %2484 = vmatpush3.bf16.msra.mxu0 %v2562_v25  ;;  %2485 = vmatprep.mubr.msk.bf16.mxu0 %vm2660_vm0, %v2659_v0 }
0x1416   :  { %2497 = vmatprep.subr.bf16.mxu0 %v2659_v0 }
0x141c   :  { %2486 = vmatmul.mubr.msk.bf16.vlgmr.msra.gmra.mrb[48].mxu0 %vm314_vm4, %v1383_v53 }
0x141d   :  { %2505 = vmatprep.mubr.msk.bf16.mxu0 %vm2660_vm0, %v2659_v0  ;;  %2498 = vmatpush3.bf16.msra.mxu0 %v2566_v7 }
0x141e   :  { %2499 = vmatprep.subr.bf16.mxu0 %v2659_v0 }
0x1421   :  { %2500 = vmatpush3.bf16.msra.mxu0 %v2567_v12 }
0x1422   :  { %2501 = vmatprep.subr.bf16.mxu0 %v2659_v0 }
0x1425   :  { %2502 = vmatpush3.bf16.msra.mxu0 %v2568_v19 }
0x1426   :  { %2503 = vmatprep.subr.bf16.mxu0 %v2659_v0 }
0x1429   :  { %2504 = vmatpush3.bf16.msra.mxu0 %v2569_v13 }
0x14e7   :  { %v1683_v28 = vpop.f32.mrb[44].mxu0 }
0x14e8   :  { %v2475_v29 = vpop.f32.mrb[45].mxu0 }
0x14e9   :  { %v1686_v30 = vpop.f32.mrb[46].mxu0 }
0x14ea   :  { %v1692_v32 = vpack.c.bf16 %v1686_v30, %v1683_v28  ;;  %v2476_v33 = vpop.f32.mrb[47].mxu0 }
0x14ec   :  { %2480 = vmatmul.mubr.msk.bf16.vlgmr.msra.gmra.mrb[52].mxu1 %vm314_vm4, %v1692_v32  ;;  %v2661_v32 = vmov 0.0|0.0  }
0x14ed   :  { %2493 = vmatprep.mubr.msk.bf16.mxu1 %vm2660_vm0, %v2659_v0  ;;  %2490 = vmatpush3.bf16.msra.mxu1 %v2564_v60  ;;  %v2203_v60 = vld [vmem:[#allocation2 + $0x69] ss:$0 sm:$0xff] }
0x14ee   :  { %2491 = vmatprep.subr.bf16.mxu1 %v2659_v0 }
0x14ef   :  { %v1786_v34 = vpop.f32.mrb[48].mxu0 }
0x14f0   :  { %v2487_v35 = vpop.f32.mrb[49].mxu0 }
0x14f1   :  { %v1789_v36 = vpop.f32.mrb[50].mxu0  ;;  %2492 = vmatpush3.bf16.msra.mxu1 %v2565_v61 }
0x14f2   :  { %v2488_v37 = vpop.f32.mrb[51].mxu0  ;;  %2516 = vmatprep.subr.bf16.mxu1 %v2661_v32 }
0x15bf   :  { %v1736_v38 = vpop.f32.mrb[52].mxu1 }
0x15c0   :  { %v1787_v39 = vadd.f32 %v1786_v34, %v1736_v38  ;;  %v2481_v40 = vpop.f32.mrb[53].mxu1 }
0x15c1   :  { %v1739_v42 = vpop.f32.mrb[54].mxu1 }
0x15c2   :  { %v1793_v43 = vadd.f32 %v1787_v39, %v2902_v62  ;;  %v1790_v44 = vadd.f32 %v1789_v36, %v1739_v42  ;;  %v2482_v45 = vpop.f32.mrb[55].mxu1  ;;  %v2199_v36 = vld [vmem:[#allocation2 + $0x88] ss:$0 sm:$0xff] }
0x15c4   :  { %v3042_v46 = vadd.f32 %v2189_v41, %v1793_v43  ;;  %v1794_v47 = vadd.f32 %v1790_v44, %v2905_v2  ;;  %v1990_v43 = vld [vmem:[#allocation2 + $0x60] sm:$0x3] }
0x15c6   :  { %v3045_v48 = vadd.f32 %v2189_v41, %v1794_v47  ;;  %v1802_v50 = vsel %vm93_vm2, %v3042_v46, 0.0 }
0x15c7   :  { %1803 = vadd.xlane.f32.xlu0 %v1802_v50 }
0x15c8   :  { %v1805_v51 = vsel %vm97_vm3, %v3045_v48, 0.0 }
0x15c9   :  { %1806 = vadd.xlane.f32.xlu1 %v1805_v51 }
0x1654   :  { %v1804_v52 = vpop.xlane.xlu0 %1803 }
0x1655   :  { %v1808_v53 = vmul.f32 0.03125, %v1804_v52 }
0x1656   :  { %v1807_v54 = vpop.xlane.xlu1 %1806 }
0x1657   :  { %v1810_v62 = vsub.f32 %v3042_v46, %v1808_v53  ;;  %v1809_v55 = vmul.f32 0.03125, %v1807_v54 }
0x1659   :  { %v1811_v56 = vsub.f32 %v3045_v48, %v1809_v55  ;;  %v1812_v57 = vmul.f32 %v1810_v62, %v1810_v62 }
0x165b   :  { %v1814_v2 = vsel %vm93_vm2, %v1812_v57, 0.0  ;;  %v1813_v58 = vmul.f32 %v1811_v56, %v1811_v56 }
0x165c   :  { %1815 = vadd.xlane.f32.xlu0 %v1814_v2 }
0x165d   :  { %v1817_v59 = vsel %vm97_vm3, %v1813_v58, 0.0 }
0x165e   :  { %1818 = vadd.xlane.f32.xlu1 %v1817_v59  ;;  %v2663_v59 = vmov 0  }
0x165f   :  { %2528 = vset.pattern.permute.xlu1 %v2663_v59  ;;  %2529 = vset.pattern.permute.xlu0 %v2663_v59 }
0x16e9   :  { %v1816_v63 = vpop.xlane.xlu0 %1815 }
0x16ea   :  { %v1820_v1 = vmul.f32 0.03125, %v1816_v63 }
0x16eb   :  { %v1819_v31 = vpop.xlane.xlu1 %1818 }
0x16ec   :  { %v1822_v3 = vadd.f32 1e-06, %v1820_v1  ;;  %v1821_v4 = vmul.f32 0.03125, %v1819_v31 }
0x16ee   :  { %2618 = vrsqrt.f32 %v1822_v3  ;;  %v1823_v6 = vadd.f32 1e-06, %v1821_v4 }
0x16f0   :  { %2620 = vrsqrt.f32 %v1823_v6 }
0x16f8   :  { %v2619_v8 = vpop.eup %2618 }
0x16f9   :  { %v1826_v9 = vmul.f32 %v2619_v8, %v1810_v62 }
0x16fa   :  { %v2621_v5 = vpop.eup %2620 }
0x16fb   :  { %v1827_v10 = vmul.f32 %v2621_v5, %v1811_v56  ;;  %v2202_v56 = vld [vmem:[#allocation2 + $0x68] ss:$0 sm:$0xff] }
0x16fd   :  { %v1832_v11 = vpack.c.bf16 %v1827_v10, %v1826_v9 }
0x16ff   :  { %2494 = vmatmul.mubr.msk.bf16.vlgmr.msra.gmra.mrb[56].mxu1 %vm93_vm2, %v1832_v11 }
0x1700   :  { %2513 = vmatprep.mubr.msk.f32.mxu1 %vm2660_vm0, %v2659_v0 }
0x17d2   :  { %v1887_v21 = vpop.f32.mrb[56].mxu1 }
0x17d3   :  { %v1888_v15 = vadd.f32 %v2190_v14, %v1887_v21  ;;  %v2495_v22 = vpop.f32.mrb[57].mxu1 }
0x17d4   :  { %v1890_v24 = vpop.f32.mrb[58].mxu1 }
0x17d5   :  { %v1896_v16 = vmul.f32 0.70710677, %v1888_v15  ;;  %v1891_v17 = vadd.f32 %v2190_v14, %v1890_v24  ;;  %v2496_v18 = vpop.f32.mrb[59].mxu1  ;;  %v1894_v0 = vmul.f32 0.5, %v1888_v15 }
0x17d7   :  { %2622 = verf.f32 %v1896_v16  ;;  %v1897_v20 = vmul.f32 0.70710677, %v1891_v17  ;;  %v1895_v26 = vmul.f32 0.5, %v1891_v17 }
0x17d9   :  { %2624 = verf.f32 %v1897_v20 }
0x17e1   :  { %v2623_v49 = vpop.eup %2622 }
0x17e2   :  { %v1900_v23 = vadd.f32 1.0, %v2623_v49 }
0x17e3   :  { %v2625_v25 = vpop.eup %2624 }
0x17e4   :  { %v1901_v27 = vadd.f32 1.0, %v2625_v25  ;;  %v1902_v28 = vmul.f32 %v1900_v23, %v1894_v0 }
0x17e6   :  { %v1903_v29 = vmul.f32 %v1901_v27, %v1895_v26 }
0x17e8   :  { %v1912_v30 = vpack.c.bf16 %v1903_v29, %v1902_v28 }
0x17ea   :  { %2506 = vmatmul.mubr.msk.bf16.vlgmr.msra.gmra.mrb[52].mxu0 %vm46_vm1, %v1912_v30 }
0x18bd   :  { %v1974_v33 = vpop.f32.mrb[52].mxu0 }
0x18be   :  { %v1981_v34 = vadd.f32 %v1974_v33, %v3042_v46  ;;  %v2507_v35 = vpop.f32.mrb[53].mxu0 }
0x18bf   :  { %v1977_v37 = vpop.f32.mrb[54].mxu0 }
0x18c0   :  { %v1982_v38 = vadd.f32 %v1977_v37, %v3045_v48  ;;  %v2508_v39 = vpop.f32.mrb[55].mxu0  ;;  %v1988_v40 = vadd.f32 %v2199_v36, %v1981_v34 }
0x18c2   :  { %v1989_v41 = vadd.f32 %v2199_v36, %v1982_v38 }
0x18c4   :  { %v2517_v42 = vpack.c.bf16 %v1989_v41, %v1988_v40 }
0x18c6   :  { %2519 = vmatpush3.bf16.msk.msra.mxu1 %vm2518_vm10, %v2517_v42 }
0x18c9   :  { %2514 = vmatmul.mubr.msk.f32.vlgmr.msra.gmra.mrb[60].mxu1 %vm362_vm6, %v1990_v43 }
0x199c   :  { %v2064_v44 = vpop.f32.mrb[60].mxu1 }
0x199d   :  { %v2068_v45 = vsel %vm97_vm3, %v2064_v44, 0.0  ;;  %v2515_v46 = vpop.f32.mrb[61].mxu1 }
0x199e   :  { %2069 = vadd.xlane.f32.xlu0 %v2068_v45 }
0x1a2b   :  { %v2070_v47 = vpop.xlane.xlu0 %2069 }
0x1a2c   :  { %v2071_v50 = vmul.f32 0.03125, %v2070_v47 }
0x1a2e   :  { %v2072_v51 = vsub.f32 %v2064_v44, %v2071_v50 }
0x1a30   :  { %v2073_v48 = vmul.f32 %v2072_v51, %v2072_v51 }
0x1a32   :  { %v2074_v52 = vsel %vm97_vm3, %v2073_v48, 0.0 }
0x1a33   :  { %2075 = vadd.xlane.f32.xlu1 %v2074_v52 }
0x1ac0   :  { %v2076_v53 = vpop.xlane.xlu1 %2075 }
0x1ac1   :  { %v2077_v54 = vmul.f32 0.03125, %v2076_v53 }
0x1ac3   :  { %v2078_v62 = vadd.f32 1e-06, %v2077_v54 }
0x1ac5   :  { %2626 = vrsqrt.f32 %v2078_v62 }
0x1acf   :  { %v2627_v55 = vpop.eup %2626 }
0x1ad0   :  { %v2080_v57 = vmul.f32 %v2627_v55, %v2072_v51 }
0x1ad2   :  { %v2087_v2 = vmul.f32 %v2202_v56, %v2080_v57 }
0x1ad4   :  { %v2088_v58 = vsel %vm97_vm3, %v2087_v2, 0.0 }
0x1ad5   :  { %2089 = vadd.xlane.f32.xlu0 %v2088_v58 }
0x1b62   :  { %v2090_v61 = vpop.xlane.xlu0 %2089 }
0x1b63   :  { %v2095_v63 = vadd.f32 %v2203_v60, %v2090_v61 }
0x1b65   :  { %v2204_v1 = vmul.f32 -1.442695, %v2095_v63 }
0x1b67   :  { %2628 = vpow2.f32 %v2204_v1 }
0x1b71   :  { %v2629_v31 = vpop.eup %2628 }
0x1b72   :  { %v2099_v3 = vadd.f32 1.0, %v2629_v31 }
0x1b74   :  { %2630 = vrcp.f32 %v2099_v3 }
0x1b7e   :  { %v2631_v4 = vpop.eup %2630 }
0x1b7f   :  { %2104 = vperm.xlu1 %2528, %v2631_v4  }
0x1bfe   :  { %v2105_v6 = vpop.permute.xlu1 %2104 }
0x1bff   :  { %2107 = vst [vmem:[%s3093_s3] sm:$0x3] %v2105_v6 }
0x1c00   :  { %2112 = vsyncpa [#allocation3], 1 }

</bundles_post_ra>
